<compile_context>
chip_gen: v7x
topology: tpu7x:2x2x1
jax: 0.10.0
libtpu: 0.0.40
codegen_flags: <defaults>
</compile_context>

<pallas_src>
import functools

import numpy as np
import jax
import jax.numpy as jnp
from jax import lax
from jax.experimental import pallas as pl
from jax.experimental.pallas import tpu as pltpu

_SQRT_HALF = 0.7071067811865476
_EPS = 1e-5  # PyTorch GroupNorm default eps


def _gelu_exact(x):
    # matches torch.nn.GELU() default (erf form)
    return 0.5 * x * (1.0 + lax.erf(x * _SQRT_HALF))


def _round_up(v, m):
    return (v + m - 1) // m * m


def _pick_bblk(b, cap=8):
    for c in range(min(b, cap), 0, -1):
        if b % c == 0:
            return c
    return 1


def _double_conv_kernel(x_ref, w1_ref, g1_ref, b1_ref, w2_ref, g2_ref, b2_ref,
                        mask_ref, out_ref, im1_scr, im2_scr, *,
                        bblk, cin, cmid, cout, h, w, mw, q0, offs, residual):
    """Processes `bblk` images per grid step.

    Layout: channels on sublanes, flattened padded spatial (y*Wp + x) on lanes,
    each sample occupying a 128-aligned segment of `mw` lanes.
      x_ref   : (bblk, cin, L)      zero-padded flattened input (L >= 2*Wp+2+mw)
      w1_ref  : (cmid, 9*cin)       conv1 weights, tap-major along K
      w2_ref  : (cout, 9*cmid)      conv2 weights
      g*/b*   : (c, 1)              GroupNorm(1, c) affine
      mask_ref: (1, mw)             1.0 where a work column is a real pixel
      out_ref : (bblk, cout, mw)    work-layout output (wrapper drops pad cols)
      im1_scr : (9*cin,  bblk*mw)   conv1 im2col scratch
      im2_scr : (9*cmid, bblk*mw)   conv2 im2col scratch
    """
    msk = mask_ref[...]                                   # (1, mw)
    w1 = w1_ref[...]
    w2 = w2_ref[...]
    g1 = g1_ref[...]
    b1 = b1_ref[...]
    g2 = g2_ref[...]
    b2 = b2_ref[...]
    inv_cnt1 = 1.0 / float(cmid * h * w)
    inv_cnt2 = 1.0 / float(cout * h * w)

    # ---- conv1 im2col for every sample (input is fully zero-padded: no fills) ----
    for b in range(bblk):
        base = b * mw
        for t, s in enumerate(offs):
            im1_scr[t * cin:(t + 1) * cin, base:base + mw] = \
                x_ref[b, :, q0 + s:q0 + s + mw]

    # one MXU matmul for the whole batch block: (cmid, 9cin) @ (9cin, bblk*mw)
    y1 = jnp.dot(w1, im1_scr[...], preferred_element_type=jnp.float32)

    # ---- per-sample GroupNorm(1, cmid) + GELU, then conv2 im2col ----
    for b in range(bblk):
        base = b * mw
        y1b = y1[:, base:base + mw]                       # (cmid, mw), lane-aligned
        mean1 = jnp.sum(y1b * msk) * inv_cnt1
        d1 = (y1b - mean1) * msk
        var1 = jnp.sum(d1 * d1) * inv_cnt1
        hact = _gelu_exact(d1 * lax.rsqrt(var1 + _EPS) * g1 + b1)
        hact = hact * msk          # zero the pad columns -> conv2 SAME padding

        for t, s in enumerate(offs):
            r0, r1 = t * cmid, (t + 1) * cmid
            lo = max(0, -s)
            hi = mw - max(0, s)
            if lo > 0:
                im2_scr[r0:r1, base:base + lo] = jnp.zeros((cmid, lo), jnp.float32)
            if hi < mw:
                im2_scr[r0:r1, base + hi:base + mw] = \
                    jnp.zeros((cmid, mw - hi), jnp.float32)
            im2_scr[r0:r1, base + lo:base + hi] = hact[:, lo + s:hi + s]

    # one MXU matmul for the whole batch block: (cout, 9cmid) @ (9cmid, bblk*mw)
    y2 = jnp.dot(w2, im2_scr[...], preferred_element_type=jnp.float32)

    # ---- per-sample GroupNorm(1, cout) (+ residual GELU) + store ----
    for b in range(bblk):
        base = b * mw
        y2b = y2[:, base:base + mw]
        mean2 = jnp.sum(y2b * msk) * inv_cnt2
        d2 = (y2b - mean2) * msk
        var2 = jnp.sum(d2 * d2) * inv_cnt2
        yo = d2 * lax.rsqrt(var2 + _EPS) * g2 + b2

        if residual:
            x_in = x_ref[b, :, q0:q0 + mw]  # center tap == original pixels
            yo = _gelu_exact(x_in + yo)

        out_ref[b] = yo.astype(out_ref.dtype)


def double_conv(x_nchw, w1_oihw, g1, b1, w2_oihw, g2, b2, *, residual=False):
    """Pallas DoubleConv. x_nchw: (B, Cin, H, W) float32 -> (B, Cout, H, W)."""
    B, Cin, H, W = x_nchw.shape
    Cmid = w1_oihw.shape[0]
    Cout = w2_oihw.shape[0]
    if residual:
        assert Cin == Cout, "residual DoubleConv requires in_channels == out_channels"

    Hp, Wp = H + 2, W + 2
    q0 = Wp + 1                        # flat offset of padded pixel (1, 1)
    M = H * Wp                         # valid work-domain length
    Mw = _round_up(M, 128)             # lane-aligned per-sample segment length
    offs = tuple((dy - 1) * Wp + (dx - 1) for dy in range(3) for dx in range(3))
    smax = Wp + 1
    L = _round_up(q0 + smax + Mw, 128)  # covers every shifted read; tail is zeros

    # --- wrapper-side layout glue (cheap XLA ops; stays in NCHW) ---
    xf = x_nchw.astype(jnp.float32)
    xpad = jnp.pad(xf, ((0, 0), (0, 0), (1, 1), (1, 1)))          # (B, Cin, Hp, Wp)
    xflat = xpad.reshape(B, Cin, Hp * Wp)
    xflat = jnp.pad(xflat, ((0, 0), (0, 0), (0, L - Hp * Wp)))    # (B, Cin, L)

    # OIHW -> (O, 9*I), tap-major then input-channel (matches im2col row order).
    w1m = jnp.transpose(w1_oihw.astype(jnp.float32), (0, 2, 3, 1)).reshape(Cmid, 9 * Cin)
    w2m = jnp.transpose(w2_oihw.astype(jnp.float32), (0, 2, 3, 1)).reshape(Cout, 9 * Cmid)
    g1r = g1.astype(jnp.float32).reshape(Cmid, 1)
    b1r = b1.astype(jnp.float32).reshape(Cmid, 1)
    g2r = g2.astype(jnp.float32).reshape(Cout, 1)
    b2r = b2.astype(jnp.float32).reshape(Cout, 1)
    idx = np.arange(Mw)
    mask = jnp.asarray(((idx % Wp < W) & (idx < M)).astype(np.float32).reshape(1, Mw))

    Bblk = _pick_bblk(B)
    grid = (B // Bblk,)

    kernel = functools.partial(
        _double_conv_kernel, bblk=Bblk, cin=Cin, cmid=Cmid, cout=Cout,
        h=H, w=W, mw=Mw, q0=q0, offs=offs, residual=residual)

    out_work = pl.pallas_call(
        kernel,
        out_shape=jax.ShapeDtypeStruct((B, Cout, Mw), jnp.float32),
        grid_spec=pltpu.PrefetchScalarGridSpec(
            num_scalar_prefetch=0,
            grid=grid,
            in_specs=[
                pl.BlockSpec((Bblk, Cin, L), lambda i: (i, 0, 0)),
                pl.BlockSpec((Cmid, 9 * Cin), lambda i: (0, 0)),
                pl.BlockSpec((Cmid, 1), lambda i: (0, 0)),
                pl.BlockSpec((Cmid, 1), lambda i: (0, 0)),
                pl.BlockSpec((Cout, 9 * Cmid), lambda i: (0, 0)),
                pl.BlockSpec((Cout, 1), lambda i: (0, 0)),
                pl.BlockSpec((Cout, 1), lambda i: (0, 0)),
                pl.BlockSpec((1, Mw), lambda i: (0, 0)),
            ],
            out_specs=pl.BlockSpec((Bblk, Cout, Mw), lambda i: (i, 0, 0)),
            scratch_shapes=[
                pltpu.VMEM((9 * Cin, Bblk * Mw), jnp.float32),   # conv1 im2col
                pltpu.VMEM((9 * Cmid, Bblk * Mw), jnp.float32),  # conv2 im2col
            ],
        ),
        compiler_params=pltpu.CompilerParams(
            dimension_semantics=("parallel",),           # batch blocks independent
            vmem_limit_bytes=48 * 1024 * 1024,
        ),
    )(xflat, w1m, g1r, b1r, w2m, g2r, b2r, mask)

    # Work layout -> NCHW: drop the segment tail and the two pad columns per row.
    # TODO(synk): for very large H*W*C (realistic UNet sizes on v7x) add a
    # row-strip grid axis with halo instead of whole-plane-per-sample residency.
    out = out_work[:, :, :M].reshape(B, Cout, H, Wp)[:, :, :, :W]
    return out


# ---------------- pure-JAX reference (mirrors the PyTorch module) ----------------
def _ref_double_conv(x, w1, g1, b1, w2, g2, b2, residual):
    def conv(hh, wgt):
        return lax.conv_general_dilated(hh, wgt, (1, 1), ((1, 1), (1, 1)),
                                        dimension_numbers=("NCHW", "OIHW", "NCHW"))

    def gn(hh, g, b):  # GroupNorm(num_groups=1), biased variance, eps=1e-5
        mean = jnp.mean(hh, axis=(1, 2, 3), keepdims=True)
        var = jnp.mean((hh - mean) ** 2, axis=(1, 2, 3), keepdims=True)
        hn = (hh - mean) / jnp.sqrt(var + _EPS)
        return hn * g[None, :, None, None] + b[None, :, None, None]

    hh = _gelu_exact(gn(conv(x, w1), g1, b1))
    hh = gn(conv(hh, w2), g2, b2)
    if residual:
        hh = _gelu_exact(x + hh)
    return hh


def _make_params(key, cin, cmid, cout):
    k1, k2, k3, k4, k5, k6 = jax.random.split(key, 6)
    w1 = 0.2 * jax.random.normal(k1, (cmid, cin, 3, 3), jnp.float32)   # OIHW
    w2 = 0.2 * jax.random.normal(k2, (cout, cmid, 3, 3), jnp.float32)
    g1 = 1.0 + 0.1 * jax.random.normal(k3, (cmid,), jnp.float32)
    b1 = 0.1 * jax.random.normal(k4, (cmid,), jnp.float32)
    g2 = 1.0 + 0.1 * jax.random.normal(k5, (cout,), jnp.float32)
    b2 = 0.1 * jax.random.normal(k6, (cout,), jnp.float32)
    return w1, g1, b1, w2, g2, b2


if __name__ == "__main__":
    key = jax.random.PRNGKey(0)
    kx, kp, kx2, kp2 = jax.random.split(key, 4)

    # Case 1: residual=False, in=4 -> mid=out=8, 16x16 spatial
    B, Cin, H, W = 2, 4, 16, 16
    Cmid, Cout = 8, 8
    x = jax.random.normal(kx, (B, Cin, H, W), jnp.float32)
    params = _make_params(kp, Cin, Cmid, Cout)
    y = jax.block_until_ready(double_conv(x, *params, residual=False))
    y_ref = _ref_double_conv(x, *params, residual=False)
    assert y.shape == (B, Cout, H, W)
    assert jnp.allclose(y, y_ref, atol=2e-3, rtol=2e-3), "non-residual mismatch"

    # Case 2: residual=True, in=mid=out=4
    Cr = 4
    x2 = jax.random.normal(kx2, (B, Cr, H, W), jnp.float32)
    params2 = _make_params(kp2, Cr, Cr, Cr)
    y2 = jax.block_until_ready(double_conv(x2, *params2, residual=True))
    y2_ref = _ref_double_conv(x2, *params2, residual=True)
    assert jnp.allclose(y2, y2_ref, atol=2e-3, rtol=2e-3), "residual mismatch"

    print("KERNEL_OK")
</pallas_src>

<mosaic_0001>
module attributes {stable_mosaic.version = 11 : i64} {
  func.func @_double_conv_kernel(%arg0: i32, %arg1: memref<2x4x512xf32, #tpu.memory_space<vmem>>, %arg2: memref<8x36xf32, #tpu.memory_space<vmem>>, %arg3: memref<8x1xf32, #tpu.memory_space<vmem>>, %arg4: memref<8x1xf32, #tpu.memory_space<vmem>>, %arg5: memref<8x72xf32, #tpu.memory_space<vmem>>, %arg6: memref<8x1xf32, #tpu.memory_space<vmem>>, %arg7: memref<8x1xf32, #tpu.memory_space<vmem>>, %arg8: memref<1x384xf32, #tpu.memory_space<vmem>>, %arg9: memref<2x8x384xf32, #tpu.memory_space<vmem>>, %arg10: memref<36x768xf32, #tpu.memory_space<vmem>>, %arg11: memref<72x768xf32, #tpu.memory_space<vmem>>) attributes {dimension_semantics = [#tpu.dimension_semantics<parallel>], iteration_bounds = array<i64: 1>, scalar_prefetch = 0 : i64, scratch_operands = 2 : i64, tpu.core_type = #tpu.core_type<tc>, window_params = [{transform_indices = @transform_0, window_bounds = array<i64: 2, 4, 512>}, {pipeline_mode = #tpu.pipeline_mode<synchronous>, transform_indices = @transform_1, window_bounds = array<i64: 8, 36>}, {pipeline_mode = #tpu.pipeline_mode<synchronous>, transform_indices = @transform_2, window_bounds = array<i64: 8, 1>}, {pipeline_mode = #tpu.pipeline_mode<synchronous>, transform_indices = @transform_3, window_bounds = array<i64: 8, 1>}, {pipeline_mode = #tpu.pipeline_mode<synchronous>, transform_indices = @transform_4, window_bounds = array<i64: 8, 72>}, {pipeline_mode = #tpu.pipeline_mode<synchronous>, transform_indices = @transform_5, window_bounds = array<i64: 8, 1>}, {pipeline_mode = #tpu.pipeline_mode<synchronous>, transform_indices = @transform_6, window_bounds = array<i64: 8, 1>}, {pipeline_mode = #tpu.pipeline_mode<synchronous>, transform_indices = @transform_7, window_bounds = array<i64: 1, 384>}, {transform_indices = @transform_8, window_bounds = array<i64: 2, 8, 384>}]} {
    %c0 = arith.constant 0 : index
    %c0_0 = arith.constant 0 : index
    %0 = vector.load %arg8[%c0, %c0_0] : memref<1x384xf32, #tpu.memory_space<vmem>>, vector<1x384xf32>
    %c0_1 = arith.constant 0 : index
    %c0_2 = arith.constant 0 : index
    %1 = vector.load %arg2[%c0_1, %c0_2] : memref<8x36xf32, #tpu.memory_space<vmem>>, vector<8x36xf32>
    %c0_3 = arith.constant 0 : index
    %c0_4 = arith.constant 0 : index
    %2 = vector.load %arg5[%c0_3, %c0_4] : memref<8x72xf32, #tpu.memory_space<vmem>>, vector<8x72xf32>
    %c0_5 = arith.constant 0 : index
    %c0_6 = arith.constant 0 : index
    %3 = vector.load %arg3[%c0_5, %c0_6] : memref<8x1xf32, #tpu.memory_space<vmem>>, vector<8x1xf32>
    %c0_7 = arith.constant 0 : index
    %c0_8 = arith.constant 0 : index
    %4 = vector.load %arg4[%c0_7, %c0_8] : memref<8x1xf32, #tpu.memory_space<vmem>>, vector<8x1xf32>
    %c0_9 = arith.constant 0 : index
    %c0_10 = arith.constant 0 : index
    %5 = vector.load %arg6[%c0_9, %c0_10] : memref<8x1xf32, #tpu.memory_space<vmem>>, vector<8x1xf32>
    %c0_11 = arith.constant 0 : index
    %c0_12 = arith.constant 0 : index
    %6 = vector.load %arg7[%c0_11, %c0_12] : memref<8x1xf32, #tpu.memory_space<vmem>>, vector<8x1xf32>
    %c0_13 = arith.constant 0 : index
    %c0_14 = arith.constant 0 : index
    %c0_15 = arith.constant 0 : index
    %7 = vector.load %arg1[%c0_13, %c0_14, %c0_15] : memref<2x4x512xf32, #tpu.memory_space<vmem>>, vector<1x4x384xf32>
    %8 = vector.shape_cast %7 : vector<1x4x384xf32> to vector<4x384xf32>
    %c0_16 = arith.constant 0 : index
    %c0_17 = arith.constant 0 : index
    %9 = vector.load %arg10[%c0_16, %c0_17] : memref<36x768xf32, #tpu.memory_space<vmem>>, vector<4x384xf32>
    tpu.vector_store %arg10[%c0_16, %c0_17], %8 {strides = array<i32>} : memref<36x768xf32, #tpu.memory_space<vmem>>, vector<4x384xf32>,
    %c0_18 = arith.constant 0 : index
    %c0_19 = arith.constant 0 : index
    %c1 = arith.constant 1 : index
    %10 = vector.load %arg1[%c0_18, %c0_19, %c1] : memref<2x4x512xf32, #tpu.memory_space<vmem>>, vector<1x4x384xf32>
    %11 = vector.shape_cast %10 : vector<1x4x384xf32> to vector<4x384xf32>
    %c4 = arith.constant 4 : index
    %c0_20 = arith.constant 0 : index
    %12 = vector.load %arg10[%c4, %c0_20] : memref<36x768xf32, #tpu.memory_space<vmem>>, vector<4x384xf32>
    tpu.vector_store %arg10[%c4, %c0_20], %11 {strides = array<i32>} : memref<36x768xf32, #tpu.memory_space<vmem>>, vector<4x384xf32>,
    %c0_21 = arith.constant 0 : index
    %c0_22 = arith.constant 0 : index
    %c2 = arith.constant 2 : index
    %13 = vector.load %arg1[%c0_21, %c0_22, %c2] : memref<2x4x512xf32, #tpu.memory_space<vmem>>, vector<1x4x384xf32>
    %14 = vector.shape_cast %13 : vector<1x4x384xf32> to vector<4x384xf32>
    %c8 = arith.constant 8 : index
    %c0_23 = arith.constant 0 : index
    %15 = vector.load %arg10[%c8, %c0_23] : memref<36x768xf32, #tpu.memory_space<vmem>>, vector<4x384xf32>
    tpu.vector_store %arg10[%c8, %c0_23], %14 {strides = array<i32>} : memref<36x768xf32, #tpu.memory_space<vmem>>, vector<4x384xf32>,
    %c0_24 = arith.constant 0 : index
    %c0_25 = arith.constant 0 : index
    %c18 = arith.constant 18 : index
    %16 = vector.load %arg1[%c0_24, %c0_25, %c18] : memref<2x4x512xf32, #tpu.memory_space<vmem>>, vector<1x4x384xf32>
    %17 = vector.shape_cast %16 : vector<1x4x384xf32> to vector<4x384xf32>
    %c12 = arith.constant 12 : index
    %c0_26 = arith.constant 0 : index
    %18 = vector.load %arg10[%c12, %c0_26] : memref<36x768xf32, #tpu.memory_space<vmem>>, vector<4x384xf32>
    tpu.vector_store %arg10[%c12, %c0_26], %17 {strides = array<i32>} : memref<36x768xf32, #tpu.memory_space<vmem>>, vector<4x384xf32>,
    %c0_27 = arith.constant 0 : index
    %c0_28 = arith.constant 0 : index
    %c19 = arith.constant 19 : index
    %19 = vector.load %arg1[%c0_27, %c0_28, %c19] : memref<2x4x512xf32, #tpu.memory_space<vmem>>, vector<1x4x384xf32>
    %20 = vector.shape_cast %19 : vector<1x4x384xf32> to vector<4x384xf32>
    %c16 = arith.constant 16 : index
    %c0_29 = arith.constant 0 : index
    %21 = vector.load %arg10[%c16, %c0_29] : memref<36x768xf32, #tpu.memory_space<vmem>>, vector<4x384xf32>
    tpu.vector_store %arg10[%c16, %c0_29], %20 {strides = array<i32>} : memref<36x768xf32, #tpu.memory_space<vmem>>, vector<4x384xf32>,
    %c0_30 = arith.constant 0 : index
    %c0_31 = arith.constant 0 : index
    %c20 = arith.constant 20 : index
    %22 = vector.load %arg1[%c0_30, %c0_31, %c20] : memref<2x4x512xf32, #tpu.memory_space<vmem>>, vector<1x4x384xf32>
    %23 = vector.shape_cast %22 : vector<1x4x384xf32> to vector<4x384xf32>
    %c20_32 = arith.constant 20 : index
    %c0_33 = arith.constant 0 : index
    %24 = vector.load %arg10[%c20_32, %c0_33] : memref<36x768xf32, #tpu.memory_space<vmem>>, vector<4x384xf32>
    tpu.vector_store %arg10[%c20_32, %c0_33], %23 {strides = array<i32>} : memref<36x768xf32, #tpu.memory_space<vmem>>, vector<4x384xf32>,
    %c0_34 = arith.constant 0 : index
    %c0_35 = arith.constant 0 : index
    %c36 = arith.constant 36 : index
    %25 = vector.load %arg1[%c0_34, %c0_35, %c36] : memref<2x4x512xf32, #tpu.memory_space<vmem>>, vector<1x4x384xf32>
    %26 = vector.shape_cast %25 : vector<1x4x384xf32> to vector<4x384xf32>
    %c24 = arith.constant 24 : index
    %c0_36 = arith.constant 0 : index
    %27 = vector.load %arg10[%c24, %c0_36] : memref<36x768xf32, #tpu.memory_space<vmem>>, vector<4x384xf32>
    tpu.vector_store %arg10[%c24, %c0_36], %26 {strides = array<i32>} : memref<36x768xf32, #tpu.memory_space<vmem>>, vector<4x384xf32>,
    %c0_37 = arith.constant 0 : index
    %c0_38 = arith.constant 0 : index
    %c37 = arith.constant 37 : index
    %28 = vector.load %arg1[%c0_37, %c0_38, %c37] : memref<2x4x512xf32, #tpu.memory_space<vmem>>, vector<1x4x384xf32>
    %29 = vector.shape_cast %28 : vector<1x4x384xf32> to vector<4x384xf32>
    %c28 = arith.constant 28 : index
    %c0_39 = arith.constant 0 : index
    %30 = vector.load %arg10[%c28, %c0_39] : memref<36x768xf32, #tpu.memory_space<vmem>>, vector<4x384xf32>
    tpu.vector_store %arg10[%c28, %c0_39], %29 {strides = array<i32>} : memref<36x768xf32, #tpu.memory_space<vmem>>, vector<4x384xf32>,
    %c0_40 = arith.constant 0 : index
    %c0_41 = arith.constant 0 : index
    %c38 = arith.constant 38 : index
    %31 = vector.load %arg1[%c0_40, %c0_41, %c38] : memref<2x4x512xf32, #tpu.memory_space<vmem>>, vector<1x4x384xf32>
    %32 = vector.shape_cast %31 : vector<1x4x384xf32> to vector<4x384xf32>
    %c32 = arith.constant 32 : index
    %c0_42 = arith.constant 0 : index
    %33 = vector.load %arg10[%c32, %c0_42] : memref<36x768xf32, #tpu.memory_space<vmem>>, vector<4x384xf32>
    tpu.vector_store %arg10[%c32, %c0_42], %32 {strides = array<i32>} : memref<36x768xf32, #tpu.memory_space<vmem>>, vector<4x384xf32>,
    %c1_43 = arith.constant 1 : index
    %c0_44 = arith.constant 0 : index
    %c0_45 = arith.constant 0 : index
    %34 = vector.load %arg1[%c1_43, %c0_44, %c0_45] : memref<2x4x512xf32, #tpu.memory_space<vmem>>, vector<1x4x384xf32>
    %35 = vector.shape_cast %34 : vector<1x4x384xf32> to vector<4x384xf32>
    %c0_46 = arith.constant 0 : index
    %c384 = arith.constant 384 : index
    %36 = vector.load %arg10[%c0_46, %c384] : memref<36x768xf32, #tpu.memory_space<vmem>>, vector<4x384xf32>
    tpu.vector_store %arg10[%c0_46, %c384], %35 {strides = array<i32>} : memref<36x768xf32, #tpu.memory_space<vmem>>, vector<4x384xf32>,
    %c1_47 = arith.constant 1 : index
    %c0_48 = arith.constant 0 : index
    %c1_49 = arith.constant 1 : index
    %37 = vector.load %arg1[%c1_47, %c0_48, %c1_49] : memref<2x4x512xf32, #tpu.memory_space<vmem>>, vector<1x4x384xf32>
    %38 = vector.shape_cast %37 : vector<1x4x384xf32> to vector<4x384xf32>
    %c4_50 = arith.constant 4 : index
    %c384_51 = arith.constant 384 : index
    %39 = vector.load %arg10[%c4_50, %c384_51] : memref<36x768xf32, #tpu.memory_space<vmem>>, vector<4x384xf32>
    tpu.vector_store %arg10[%c4_50, %c384_51], %38 {strides = array<i32>} : memref<36x768xf32, #tpu.memory_space<vmem>>, vector<4x384xf32>,
    %c1_52 = arith.constant 1 : index
    %c0_53 = arith.constant 0 : index
    %c2_54 = arith.constant 2 : index
    %40 = vector.load %arg1[%c1_52, %c0_53, %c2_54] : memref<2x4x512xf32, #tpu.memory_space<vmem>>, vector<1x4x384xf32>
    %41 = vector.shape_cast %40 : vector<1x4x384xf32> to vector<4x384xf32>
    %c8_55 = arith.constant 8 : index
    %c384_56 = arith.constant 384 : index
    %42 = vector.load %arg10[%c8_55, %c384_56] : memref<36x768xf32, #tpu.memory_space<vmem>>, vector<4x384xf32>
    tpu.vector_store %arg10[%c8_55, %c384_56], %41 {strides = array<i32>} : memref<36x768xf32, #tpu.memory_space<vmem>>, vector<4x384xf32>,
    %c1_57 = arith.constant 1 : index
    %c0_58 = arith.constant 0 : index
    %c18_59 = arith.constant 18 : index
    %43 = vector.load %arg1[%c1_57, %c0_58, %c18_59] : memref<2x4x512xf32, #tpu.memory_space<vmem>>, vector<1x4x384xf32>
    %44 = vector.shape_cast %43 : vector<1x4x384xf32> to vector<4x384xf32>
    %c12_60 = arith.constant 12 : index
    %c384_61 = arith.constant 384 : index
    %45 = vector.load %arg10[%c12_60, %c384_61] : memref<36x768xf32, #tpu.memory_space<vmem>>, vector<4x384xf32>
    tpu.vector_store %arg10[%c12_60, %c384_61], %44 {strides = array<i32>} : memref<36x768xf32, #tpu.memory_space<vmem>>, vector<4x384xf32>,
    %c1_62 = arith.constant 1 : index
    %c0_63 = arith.constant 0 : index
    %c19_64 = arith.constant 19 : index
    %46 = vector.load %arg1[%c1_62, %c0_63, %c19_64] : memref<2x4x512xf32, #tpu.memory_space<vmem>>, vector<1x4x384xf32>
    %47 = vector.shape_cast %46 : vector<1x4x384xf32> to vector<4x384xf32>
    %c16_65 = arith.constant 16 : index
    %c384_66 = arith.constant 384 : index
    %48 = vector.load %arg10[%c16_65, %c384_66] : memref<36x768xf32, #tpu.memory_space<vmem>>, vector<4x384xf32>
    tpu.vector_store %arg10[%c16_65, %c384_66], %47 {strides = array<i32>} : memref<36x768xf32, #tpu.memory_space<vmem>>, vector<4x384xf32>,
    %c1_67 = arith.constant 1 : index
    %c0_68 = arith.constant 0 : index
    %c20_69 = arith.constant 20 : index
    %49 = vector.load %arg1[%c1_67, %c0_68, %c20_69] : memref<2x4x512xf32, #tpu.memory_space<vmem>>, vector<1x4x384xf32>
    %50 = vector.shape_cast %49 : vector<1x4x384xf32> to vector<4x384xf32>
    %c20_70 = arith.constant 20 : index
    %c384_71 = arith.constant 384 : index
    %51 = vector.load %arg10[%c20_70, %c384_71] : memref<36x768xf32, #tpu.memory_space<vmem>>, vector<4x384xf32>
    tpu.vector_store %arg10[%c20_70, %c384_71], %50 {strides = array<i32>} : memref<36x768xf32, #tpu.memory_space<vmem>>, vector<4x384xf32>,
    %c1_72 = arith.constant 1 : index
    %c0_73 = arith.constant 0 : index
    %c36_74 = arith.constant 36 : index
    %52 = vector.load %arg1[%c1_72, %c0_73, %c36_74] : memref<2x4x512xf32, #tpu.memory_space<vmem>>, vector<1x4x384xf32>
    %53 = vector.shape_cast %52 : vector<1x4x384xf32> to vector<4x384xf32>
    %c24_75 = arith.constant 24 : index
    %c384_76 = arith.constant 384 : index
    %54 = vector.load %arg10[%c24_75, %c384_76] : memref<36x768xf32, #tpu.memory_space<vmem>>, vector<4x384xf32>
    tpu.vector_store %arg10[%c24_75, %c384_76], %53 {strides = array<i32>} : memref<36x768xf32, #tpu.memory_space<vmem>>, vector<4x384xf32>,
    %c1_77 = arith.constant 1 : index
    %c0_78 = arith.constant 0 : index
    %c37_79 = arith.constant 37 : index
    %55 = vector.load %arg1[%c1_77, %c0_78, %c37_79] : memref<2x4x512xf32, #tpu.memory_space<vmem>>, vector<1x4x384xf32>
    %56 = vector.shape_cast %55 : vector<1x4x384xf32> to vector<4x384xf32>
    %c28_80 = arith.constant 28 : index
    %c384_81 = arith.constant 384 : index
    %57 = vector.load %arg10[%c28_80, %c384_81] : memref<36x768xf32, #tpu.memory_space<vmem>>, vector<4x384xf32>
    tpu.vector_store %arg10[%c28_80, %c384_81], %56 {strides = array<i32>} : memref<36x768xf32, #tpu.memory_space<vmem>>, vector<4x384xf32>,
    %c1_82 = arith.constant 1 : index
    %c0_83 = arith.constant 0 : index
    %c38_84 = arith.constant 38 : index
    %58 = vector.load %arg1[%c1_82, %c0_83, %c38_84] : memref<2x4x512xf32, #tpu.memory_space<vmem>>, vector<1x4x384xf32>
    %59 = vector.shape_cast %58 : vector<1x4x384xf32> to vector<4x384xf32>
    %c32_85 = arith.constant 32 : index
    %c384_86 = arith.constant 384 : index
    %60 = vector.load %arg10[%c32_85, %c384_86] : memref<36x768xf32, #tpu.memory_space<vmem>>, vector<4x384xf32>
    tpu.vector_store %arg10[%c32_85, %c384_86], %59 {strides = array<i32>} : memref<36x768xf32, #tpu.memory_space<vmem>>, vector<4x384xf32>,
    %c0_87 = arith.constant 0 : index
    %c0_88 = arith.constant 0 : index
    %61 = vector.load %arg10[%c0_87, %c0_88] : memref<36x768xf32, #tpu.memory_space<vmem>>, vector<36x768xf32>
    %cst = arith.constant dense<0.000000e+00> : vector<8x768xf32>
    %62 = tpu.matmul %1, %61, %cst {dimension_numbers = #tpu.dot_dimension_numbers<[1], [0], [0], [1], [0, 0, 1, 1], [], []>} : vector<8x36xf32>, vector<36x768xf32>, vector<8x768xf32> -> vector<8x768xf32>
    %63 = vector.extract_strided_slice %62 {offsets = [0, 0], sizes = [8, 384], strides = [1, 1]} : vector<8x768xf32> to vector<8x384xf32>
    %64 = vector.broadcast %0 : vector<1x384xf32> to vector<8x384xf32>
    %65 = arith.mulf %63, %64 : vector<8x384xf32>
    %66 = vector.shape_cast %65 : vector<8x384xf32> to vector<1x8x384xf32>
    %cst_89 = arith.constant dense<0.000000e+00> : vector<1xf32>
    %67 = vector.multi_reduction <add>, %66, %cst_89 [1, 2] : vector<1x8x384xf32> to vector<1xf32>
    %68 = vector.shape_cast %67 : vector<1xf32> to vector<1x1x1xf32>
    %69 = vector.extract %68[0, 0, 0] : f32 from vector<1x1x1xf32>
    %cst_90 = arith.constant 4.8828125E-4 : f32
    %70 = arith.mulf %69, %cst_90 : f32
    %71 = vector.broadcast %70 : f32 to vector<8x384xf32>
    %72 = arith.subf %63, %71 : vector<8x384xf32>
    %73 = vector.broadcast %0 : vector<1x384xf32> to vector<8x384xf32>
    %74 = arith.mulf %72, %73 : vector<8x384xf32>
    %75 = arith.mulf %74, %74 : vector<8x384xf32>
    %76 = vector.shape_cast %75 : vector<8x384xf32> to vector<1x8x384xf32>
    %cst_91 = arith.constant dense<0.000000e+00> : vector<1xf32>
    %77 = vector.multi_reduction <add>, %76, %cst_91 [1, 2] : vector<1x8x384xf32> to vector<1xf32>
    %78 = vector.shape_cast %77 : vector<1xf32> to vector<1x1x1xf32>
    %79 = vector.extract %78[0, 0, 0] : f32 from vector<1x1x1xf32>
    %cst_92 = arith.constant 4.8828125E-4 : f32
    %80 = arith.mulf %79, %cst_92 : f32
    %cst_93 = arith.constant 9.99999974E-6 : f32
    %81 = arith.addf %80, %cst_93 : f32
    %82 = math.rsqrt %81 : f32
    %83 = vector.broadcast %82 : f32 to vector<8x384xf32>
    %84 = arith.mulf %74, %83 : vector<8x384xf32>
    %85 = vector.broadcast %3 : vector<8x1xf32> to vector<8x384xf32>
    %86 = arith.mulf %84, %85 : vector<8x384xf32>
    %87 = vector.broadcast %4 : vector<8x1xf32> to vector<8x384xf32>
    %88 = arith.addf %86, %87 : vector<8x384xf32>
    %cst_94 = arith.constant 5.000000e-01 : f32
    %89 = vector.broadcast %cst_94 : f32 to vector<8x384xf32>
    %90 = arith.mulf %89, %88 : vector<8x384xf32>
    %cst_95 = arith.constant 0.707106769 : f32
    %91 = vector.broadcast %cst_95 : f32 to vector<8x384xf32>
    %92 = arith.mulf %88, %91 : vector<8x384xf32>
    %93 = math.erf %92 : vector<8x384xf32>
    %cst_96 = arith.constant 1.000000e+00 : f32
    %94 = vector.broadcast %cst_96 : f32 to vector<8x384xf32>
    %95 = arith.addf %94, %93 : vector<8x384xf32>
    %96 = arith.mulf %90, %95 : vector<8x384xf32>
    %97 = vector.broadcast %0 : vector<1x384xf32> to vector<8x384xf32>
    %98 = arith.mulf %96, %97 : vector<8x384xf32>
    %cst_97 = arith.constant 0.000000e+00 : f32
    %99 = vector.broadcast %cst_97 : f32 to vector<8x19xf32>
    %c0_98 = arith.constant 0 : index
    %c0_99 = arith.constant 0 : index
    %100 = vector.load %arg11[%c0_98, %c0_99] : memref<72x768xf32, #tpu.memory_space<vmem>>, vector<8x19xf32>
    tpu.vector_store %arg11[%c0_98, %c0_99], %99 {strides = array<i32>} : memref<72x768xf32, #tpu.memory_space<vmem>>, vector<8x19xf32>,
    %101 = vector.extract_strided_slice %98 {offsets = [0, 0], sizes = [8, 365], strides = [1, 1]} : vector<8x384xf32> to vector<8x365xf32>
    %c0_100 = arith.constant 0 : index
    %c19_101 = arith.constant 19 : index
    %102 = vector.load %arg11[%c0_100, %c19_101] : memref<72x768xf32, #tpu.memory_space<vmem>>, vector<8x365xf32>
    tpu.vector_store %arg11[%c0_100, %c19_101], %101 {strides = array<i32>} : memref<72x768xf32, #tpu.memory_space<vmem>>, vector<8x365xf32>,
    %cst_102 = arith.constant 0.000000e+00 : f32
    %103 = vector.broadcast %cst_102 : f32 to vector<8x18xf32>
    %c8_103 = arith.constant 8 : index
    %c0_104 = arith.constant 0 : index
    %104 = vector.load %arg11[%c8_103, %c0_104] : memref<72x768xf32, #tpu.memory_space<vmem>>, vector<8x18xf32>
    tpu.vector_store %arg11[%c8_103, %c0_104], %103 {strides = array<i32>} : memref<72x768xf32, #tpu.memory_space<vmem>>, vector<8x18xf32>,
    %105 = vector.extract_strided_slice %98 {offsets = [0, 0], sizes = [8, 366], strides = [1, 1]} : vector<8x384xf32> to vector<8x366xf32>
    %c8_105 = arith.constant 8 : index
    %c18_106 = arith.constant 18 : index
    %106 = vector.load %arg11[%c8_105, %c18_106] : memref<72x768xf32, #tpu.memory_space<vmem>>, vector<8x366xf32>
    tpu.vector_store %arg11[%c8_105, %c18_106], %105 {strides = array<i32>} : memref<72x768xf32, #tpu.memory_space<vmem>>, vector<8x366xf32>,
    %cst_107 = arith.constant 0.000000e+00 : f32
    %107 = vector.broadcast %cst_107 : f32 to vector<8x17xf32>
    %c16_108 = arith.constant 16 : index
    %c0_109 = arith.constant 0 : index
    %108 = vector.load %arg11[%c16_108, %c0_109] : memref<72x768xf32, #tpu.memory_space<vmem>>, vector<8x17xf32>
    tpu.vector_store %arg11[%c16_108, %c0_109], %107 {strides = array<i32>} : memref<72x768xf32, #tpu.memory_space<vmem>>, vector<8x17xf32>,
    %109 = vector.extract_strided_slice %98 {offsets = [0, 0], sizes = [8, 367], strides = [1, 1]} : vector<8x384xf32> to vector<8x367xf32>
    %c16_110 = arith.constant 16 : index
    %c17 = arith.constant 17 : index
    %110 = vector.load %arg11[%c16_110, %c17] : memref<72x768xf32, #tpu.memory_space<vmem>>, vector<8x367xf32>
    tpu.vector_store %arg11[%c16_110, %c17], %109 {strides = array<i32>} : memref<72x768xf32, #tpu.memory_space<vmem>>, vector<8x367xf32>,
    %cst_111 = arith.constant 0.000000e+00 : f32
    %111 = vector.broadcast %cst_111 : f32 to vector<8x1xf32>
    %c24_112 = arith.constant 24 : index
    %c0_113 = arith.constant 0 : index
    %112 = vector.load %arg11[%c24_112, %c0_113] : memref<72x768xf32, #tpu.memory_space<vmem>>, vector<8x1xf32>
    tpu.vector_store %arg11[%c24_112, %c0_113], %111 {strides = array<i32>} : memref<72x768xf32, #tpu.memory_space<vmem>>, vector<8x1xf32>,
    %113 = vector.extract_strided_slice %98 {offsets = [0, 0], sizes = [8, 383], strides = [1, 1]} : vector<8x384xf32> to vector<8x383xf32>
    %c24_114 = arith.constant 24 : index
    %c1_115 = arith.constant 1 : index
    %114 = vector.load %arg11[%c24_114, %c1_115] : memref<72x768xf32, #tpu.memory_space<vmem>>, vector<8x383xf32>
    tpu.vector_store %arg11[%c24_114, %c1_115], %113 {strides = array<i32>} : memref<72x768xf32, #tpu.memory_space<vmem>>, vector<8x383xf32>,
    %c32_116 = arith.constant 32 : index
    %c0_117 = arith.constant 0 : index
    %115 = vector.load %arg11[%c32_116, %c0_117] : memref<72x768xf32, #tpu.memory_space<vmem>>, vector<8x384xf32>
    tpu.vector_store %arg11[%c32_116, %c0_117], %98 {strides = array<i32>} : memref<72x768xf32, #tpu.memory_space<vmem>>, vector<8x384xf32>,
    %cst_118 = arith.constant 0.000000e+00 : f32
    %116 = vector.broadcast %cst_118 : f32 to vector<8x1xf32>
    %c40 = arith.constant 40 : index
    %c383 = arith.constant 383 : index
    %117 = vector.load %arg11[%c40, %c383] : memref<72x768xf32, #tpu.memory_space<vmem>>, vector<8x1xf32>
    tpu.vector_store %arg11[%c40, %c383], %116 {strides = array<i32>} : memref<72x768xf32, #tpu.memory_space<vmem>>, vector<8x1xf32>,
    %118 = vector.extract_strided_slice %98 {offsets = [0, 1], sizes = [8, 383], strides = [1, 1]} : vector<8x384xf32> to vector<8x383xf32>
    %c40_119 = arith.constant 40 : index
    %c0_120 = arith.constant 0 : index
    %119 = vector.load %arg11[%c40_119, %c0_120] : memref<72x768xf32, #tpu.memory_space<vmem>>, vector<8x383xf32>
    tpu.vector_store %arg11[%c40_119, %c0_120], %118 {strides = array<i32>} : memref<72x768xf32, #tpu.memory_space<vmem>>, vector<8x383xf32>,
    %cst_121 = arith.constant 0.000000e+00 : f32
    %120 = vector.broadcast %cst_121 : f32 to vector<8x17xf32>
    %c48 = arith.constant 48 : index
    %c367 = arith.constant 367 : index
    %121 = vector.load %arg11[%c48, %c367] : memref<72x768xf32, #tpu.memory_space<vmem>>, vector<8x17xf32>
    tpu.vector_store %arg11[%c48, %c367], %120 {strides = array<i32>} : memref<72x768xf32, #tpu.memory_space<vmem>>, vector<8x17xf32>,
    %122 = vector.extract_strided_slice %98 {offsets = [0, 17], sizes = [8, 367], strides = [1, 1]} : vector<8x384xf32> to vector<8x367xf32>
    %c48_122 = arith.constant 48 : index
    %c0_123 = arith.constant 0 : index
    %123 = vector.load %arg11[%c48_122, %c0_123] : memref<72x768xf32, #tpu.memory_space<vmem>>, vector<8x367xf32>
    tpu.vector_store %arg11[%c48_122, %c0_123], %122 {strides = array<i32>} : memref<72x768xf32, #tpu.memory_space<vmem>>, vector<8x367xf32>,
    %cst_124 = arith.constant 0.000000e+00 : f32
    %124 = vector.broadcast %cst_124 : f32 to vector<8x18xf32>
    %c56 = arith.constant 56 : index
    %c366 = arith.constant 366 : index
    %125 = vector.load %arg11[%c56, %c366] : memref<72x768xf32, #tpu.memory_space<vmem>>, vector<8x18xf32>
    tpu.vector_store %arg11[%c56, %c366], %124 {strides = array<i32>} : memref<72x768xf32, #tpu.memory_space<vmem>>, vector<8x18xf32>,
    %126 = vector.extract_strided_slice %98 {offsets = [0, 18], sizes = [8, 366], strides = [1, 1]} : vector<8x384xf32> to vector<8x366xf32>
    %c56_125 = arith.constant 56 : index
    %c0_126 = arith.constant 0 : index
    %127 = vector.load %arg11[%c56_125, %c0_126] : memref<72x768xf32, #tpu.memory_space<vmem>>, vector<8x366xf32>
    tpu.vector_store %arg11[%c56_125, %c0_126], %126 {strides = array<i32>} : memref<72x768xf32, #tpu.memory_space<vmem>>, vector<8x366xf32>,
    %cst_127 = arith.constant 0.000000e+00 : f32
    %128 = vector.broadcast %cst_127 : f32 to vector<8x19xf32>
    %c64 = arith.constant 64 : index
    %c365 = arith.constant 365 : index
    %129 = vector.load %arg11[%c64, %c365] : memref<72x768xf32, #tpu.memory_space<vmem>>, vector<8x19xf32>
    tpu.vector_store %arg11[%c64, %c365], %128 {strides = array<i32>} : memref<72x768xf32, #tpu.memory_space<vmem>>, vector<8x19xf32>,
    %130 = vector.extract_strided_slice %98 {offsets = [0, 19], sizes = [8, 365], strides = [1, 1]} : vector<8x384xf32> to vector<8x365xf32>
    %c64_128 = arith.constant 64 : index
    %c0_129 = arith.constant 0 : index
    %131 = vector.load %arg11[%c64_128, %c0_129] : memref<72x768xf32, #tpu.memory_space<vmem>>, vector<8x365xf32>
    tpu.vector_store %arg11[%c64_128, %c0_129], %130 {strides = array<i32>} : memref<72x768xf32, #tpu.memory_space<vmem>>, vector<8x365xf32>,
    %132 = vector.extract_strided_slice %62 {offsets = [0, 384], sizes = [8, 384], strides = [1, 1]} : vector<8x768xf32> to vector<8x384xf32>
    %133 = vector.broadcast %0 : vector<1x384xf32> to vector<8x384xf32>
    %134 = arith.mulf %132, %133 : vector<8x384xf32>
    %135 = vector.shape_cast %134 : vector<8x384xf32> to vector<1x8x384xf32>
    %cst_130 = arith.constant dense<0.000000e+00> : vector<1xf32>
    %136 = vector.multi_reduction <add>, %135, %cst_130 [1, 2] : vector<1x8x384xf32> to vector<1xf32>
    %137 = vector.shape_cast %136 : vector<1xf32> to vector<1x1x1xf32>
    %138 = vector.extract %137[0, 0, 0] : f32 from vector<1x1x1xf32>
    %cst_131 = arith.constant 4.8828125E-4 : f32
    %139 = arith.mulf %138, %cst_131 : f32
    %140 = vector.broadcast %139 : f32 to vector<8x384xf32>
    %141 = arith.subf %132, %140 : vector<8x384xf32>
    %142 = vector.broadcast %0 : vector<1x384xf32> to vector<8x384xf32>
    %143 = arith.mulf %141, %142 : vector<8x384xf32>
    %144 = arith.mulf %143, %143 : vector<8x384xf32>
    %145 = vector.shape_cast %144 : vector<8x384xf32> to vector<1x8x384xf32>
    %cst_132 = arith.constant dense<0.000000e+00> : vector<1xf32>
    %146 = vector.multi_reduction <add>, %145, %cst_132 [1, 2] : vector<1x8x384xf32> to vector<1xf32>
    %147 = vector.shape_cast %146 : vector<1xf32> to vector<1x1x1xf32>
    %148 = vector.extract %147[0, 0, 0] : f32 from vector<1x1x1xf32>
    %cst_133 = arith.constant 4.8828125E-4 : f32
    %149 = arith.mulf %148, %cst_133 : f32
    %cst_134 = arith.constant 9.99999974E-6 : f32
    %150 = arith.addf %149, %cst_134 : f32
    %151 = math.rsqrt %150 : f32
    %152 = vector.broadcast %151 : f32 to vector<8x384xf32>
    %153 = arith.mulf %143, %152 : vector<8x384xf32>
    %154 = vector.broadcast %3 : vector<8x1xf32> to vector<8x384xf32>
    %155 = arith.mulf %153, %154 : vector<8x384xf32>
    %156 = vector.broadcast %4 : vector<8x1xf32> to vector<8x384xf32>
    %157 = arith.addf %155, %156 : vector<8x384xf32>
    %cst_135 = arith.constant 5.000000e-01 : f32
    %158 = vector.broadcast %cst_135 : f32 to vector<8x384xf32>
    %159 = arith.mulf %158, %157 : vector<8x384xf32>
    %cst_136 = arith.constant 0.707106769 : f32
    %160 = vector.broadcast %cst_136 : f32 to vector<8x384xf32>
    %161 = arith.mulf %157, %160 : vector<8x384xf32>
    %162 = math.erf %161 : vector<8x384xf32>
    %cst_137 = arith.constant 1.000000e+00 : f32
    %163 = vector.broadcast %cst_137 : f32 to vector<8x384xf32>
    %164 = arith.addf %163, %162 : vector<8x384xf32>
    %165 = arith.mulf %159, %164 : vector<8x384xf32>
    %166 = vector.broadcast %0 : vector<1x384xf32> to vector<8x384xf32>
    %167 = arith.mulf %165, %166 : vector<8x384xf32>
    %cst_138 = arith.constant 0.000000e+00 : f32
    %168 = vector.broadcast %cst_138 : f32 to vector<8x19xf32>
    %c0_139 = arith.constant 0 : index
    %c384_140 = arith.constant 384 : index
    %169 = vector.load %arg11[%c0_139, %c384_140] : memref<72x768xf32, #tpu.memory_space<vmem>>, vector<8x19xf32>
    tpu.vector_store %arg11[%c0_139, %c384_140], %168 {strides = array<i32>} : memref<72x768xf32, #tpu.memory_space<vmem>>, vector<8x19xf32>,
    %170 = vector.extract_strided_slice %167 {offsets = [0, 0], sizes = [8, 365], strides = [1, 1]} : vector<8x384xf32> to vector<8x365xf32>
    %c0_141 = arith.constant 0 : index
    %c403 = arith.constant 403 : index
    %171 = vector.load %arg11[%c0_141, %c403] : memref<72x768xf32, #tpu.memory_space<vmem>>, vector<8x365xf32>
    tpu.vector_store %arg11[%c0_141, %c403], %170 {strides = array<i32>} : memref<72x768xf32, #tpu.memory_space<vmem>>, vector<8x365xf32>,
    %cst_142 = arith.constant 0.000000e+00 : f32
    %172 = vector.broadcast %cst_142 : f32 to vector<8x18xf32>
    %c8_143 = arith.constant 8 : index
    %c384_144 = arith.constant 384 : index
    %173 = vector.load %arg11[%c8_143, %c384_144] : memref<72x768xf32, #tpu.memory_space<vmem>>, vector<8x18xf32>
    tpu.vector_store %arg11[%c8_143, %c384_144], %172 {strides = array<i32>} : memref<72x768xf32, #tpu.memory_space<vmem>>, vector<8x18xf32>,
    %174 = vector.extract_strided_slice %167 {offsets = [0, 0], sizes = [8, 366], strides = [1, 1]} : vector<8x384xf32> to vector<8x366xf32>
    %c8_145 = arith.constant 8 : index
    %c402 = arith.constant 402 : index
    %175 = vector.load %arg11[%c8_145, %c402] : memref<72x768xf32, #tpu.memory_space<vmem>>, vector<8x366xf32>
    tpu.vector_store %arg11[%c8_145, %c402], %174 {strides = array<i32>} : memref<72x768xf32, #tpu.memory_space<vmem>>, vector<8x366xf32>,
    %cst_146 = arith.constant 0.000000e+00 : f32
    %176 = vector.broadcast %cst_146 : f32 to vector<8x17xf32>
    %c16_147 = arith.constant 16 : index
    %c384_148 = arith.constant 384 : index
    %177 = vector.load %arg11[%c16_147, %c384_148] : memref<72x768xf32, #tpu.memory_space<vmem>>, vector<8x17xf32>
    tpu.vector_store %arg11[%c16_147, %c384_148], %176 {strides = array<i32>} : memref<72x768xf32, #tpu.memory_space<vmem>>, vector<8x17xf32>,
    %178 = vector.extract_strided_slice %167 {offsets = [0, 0], sizes = [8, 367], strides = [1, 1]} : vector<8x384xf32> to vector<8x367xf32>
    %c16_149 = arith.constant 16 : index
    %c401 = arith.constant 401 : index
    %179 = vector.load %arg11[%c16_149, %c401] : memref<72x768xf32, #tpu.memory_space<vmem>>, vector<8x367xf32>
    tpu.vector_store %arg11[%c16_149, %c401], %178 {strides = array<i32>} : memref<72x768xf32, #tpu.memory_space<vmem>>, vector<8x367xf32>,
    %cst_150 = arith.constant 0.000000e+00 : f32
    %180 = vector.broadcast %cst_150 : f32 to vector<8x1xf32>
    %c24_151 = arith.constant 24 : index
    %c384_152 = arith.constant 384 : index
    %181 = vector.load %arg11[%c24_151, %c384_152] : memref<72x768xf32, #tpu.memory_space<vmem>>, vector<8x1xf32>
    tpu.vector_store %arg11[%c24_151, %c384_152], %180 {strides = array<i32>} : memref<72x768xf32, #tpu.memory_space<vmem>>, vector<8x1xf32>,
    %182 = vector.extract_strided_slice %167 {offsets = [0, 0], sizes = [8, 383], strides = [1, 1]} : vector<8x384xf32> to vector<8x383xf32>
    %c24_153 = arith.constant 24 : index
    %c385 = arith.constant 385 : index
    %183 = vector.load %arg11[%c24_153, %c385] : memref<72x768xf32, #tpu.memory_space<vmem>>, vector<8x383xf32>
    tpu.vector_store %arg11[%c24_153, %c385], %182 {strides = array<i32>} : memref<72x768xf32, #tpu.memory_space<vmem>>, vector<8x383xf32>,
    %c32_154 = arith.constant 32 : index
    %c384_155 = arith.constant 384 : index
    %184 = vector.load %arg11[%c32_154, %c384_155] : memref<72x768xf32, #tpu.memory_space<vmem>>, vector<8x384xf32>
    tpu.vector_store %arg11[%c32_154, %c384_155], %167 {strides = array<i32>} : memref<72x768xf32, #tpu.memory_space<vmem>>, vector<8x384xf32>,
    %cst_156 = arith.constant 0.000000e+00 : f32
    %185 = vector.broadcast %cst_156 : f32 to vector<8x1xf32>
    %c40_157 = arith.constant 40 : index
    %c767 = arith.constant 767 : index
    %186 = vector.load %arg11[%c40_157, %c767] : memref<72x768xf32, #tpu.memory_space<vmem>>, vector<8x1xf32>
    tpu.vector_store %arg11[%c40_157, %c767], %185 {strides = array<i32>} : memref<72x768xf32, #tpu.memory_space<vmem>>, vector<8x1xf32>,
    %187 = vector.extract_strided_slice %167 {offsets = [0, 1], sizes = [8, 383], strides = [1, 1]} : vector<8x384xf32> to vector<8x383xf32>
    %c40_158 = arith.constant 40 : index
    %c384_159 = arith.constant 384 : index
    %188 = vector.load %arg11[%c40_158, %c384_159] : memref<72x768xf32, #tpu.memory_space<vmem>>, vector<8x383xf32>
    tpu.vector_store %arg11[%c40_158, %c384_159], %187 {strides = array<i32>} : memref<72x768xf32, #tpu.memory_space<vmem>>, vector<8x383xf32>,
    %cst_160 = arith.constant 0.000000e+00 : f32
    %189 = vector.broadcast %cst_160 : f32 to vector<8x17xf32>
    %c48_161 = arith.constant 48 : index
    %c751 = arith.constant 751 : index
    %190 = vector.load %arg11[%c48_161, %c751] : memref<72x768xf32, #tpu.memory_space<vmem>>, vector<8x17xf32>
    tpu.vector_store %arg11[%c48_161, %c751], %189 {strides = array<i32>} : memref<72x768xf32, #tpu.memory_space<vmem>>, vector<8x17xf32>,
    %191 = vector.extract_strided_slice %167 {offsets = [0, 17], sizes = [8, 367], strides = [1, 1]} : vector<8x384xf32> to vector<8x367xf32>
    %c48_162 = arith.constant 48 : index
    %c384_163 = arith.constant 384 : index
    %192 = vector.load %arg11[%c48_162, %c384_163] : memref<72x768xf32, #tpu.memory_space<vmem>>, vector<8x367xf32>
    tpu.vector_store %arg11[%c48_162, %c384_163], %191 {strides = array<i32>} : memref<72x768xf32, #tpu.memory_space<vmem>>, vector<8x367xf32>,
    %cst_164 = arith.constant 0.000000e+00 : f32
    %193 = vector.broadcast %cst_164 : f32 to vector<8x18xf32>
    %c56_165 = arith.constant 56 : index
    %c750 = arith.constant 750 : index
    %194 = vector.load %arg11[%c56_165, %c750] : memref<72x768xf32, #tpu.memory_space<vmem>>, vector<8x18xf32>
    tpu.vector_store %arg11[%c56_165, %c750], %193 {strides = array<i32>} : memref<72x768xf32, #tpu.memory_space<vmem>>, vector<8x18xf32>,
    %195 = vector.extract_strided_slice %167 {offsets = [0, 18], sizes = [8, 366], strides = [1, 1]} : vector<8x384xf32> to vector<8x366xf32>
    %c56_166 = arith.constant 56 : index
    %c384_167 = arith.constant 384 : index
    %196 = vector.load %arg11[%c56_166, %c384_167] : memref<72x768xf32, #tpu.memory_space<vmem>>, vector<8x366xf32>
    tpu.vector_store %arg11[%c56_166, %c384_167], %195 {strides = array<i32>} : memref<72x768xf32, #tpu.memory_space<vmem>>, vector<8x366xf32>,
    %cst_168 = arith.constant 0.000000e+00 : f32
    %197 = vector.broadcast %cst_168 : f32 to vector<8x19xf32>
    %c64_169 = arith.constant 64 : index
    %c749 = arith.constant 749 : index
    %198 = vector.load %arg11[%c64_169, %c749] : memref<72x768xf32, #tpu.memory_space<vmem>>, vector<8x19xf32>
    tpu.vector_store %arg11[%c64_169, %c749], %197 {strides = array<i32>} : memref<72x768xf32, #tpu.memory_space<vmem>>, vector<8x19xf32>,
    %199 = vector.extract_strided_slice %167 {offsets = [0, 19], sizes = [8, 365], strides = [1, 1]} : vector<8x384xf32> to vector<8x365xf32>
    %c64_170 = arith.constant 64 : index
    %c384_171 = arith.constant 384 : index
    %200 = vector.load %arg11[%c64_170, %c384_171] : memref<72x768xf32, #tpu.memory_space<vmem>>, vector<8x365xf32>
    tpu.vector_store %arg11[%c64_170, %c384_171], %199 {strides = array<i32>} : memref<72x768xf32, #tpu.memory_space<vmem>>, vector<8x365xf32>,
    %c0_172 = arith.constant 0 : index
    %c0_173 = arith.constant 0 : index
    %201 = vector.load %arg11[%c0_172, %c0_173] : memref<72x768xf32, #tpu.memory_space<vmem>>, vector<72x768xf32>
    %cst_174 = arith.constant dense<0.000000e+00> : vector<8x768xf32>
    %202 = tpu.matmul %2, %201, %cst_174 {dimension_numbers = #tpu.dot_dimension_numbers<[1], [0], [0], [1], [0, 0, 1, 1], [], []>} : vector<8x72xf32>, vector<72x768xf32>, vector<8x768xf32> -> vector<8x768xf32>
    %203 = vector.extract_strided_slice %202 {offsets = [0, 0], sizes = [8, 384], strides = [1, 1]} : vector<8x768xf32> to vector<8x384xf32>
    %204 = vector.broadcast %0 : vector<1x384xf32> to vector<8x384xf32>
    %205 = arith.mulf %203, %204 : vector<8x384xf32>
    %206 = vector.shape_cast %205 : vector<8x384xf32> to vector<1x8x384xf32>
    %cst_175 = arith.constant dense<0.000000e+00> : vector<1xf32>
    %207 = vector.multi_reduction <add>, %206, %cst_175 [1, 2] : vector<1x8x384xf32> to vector<1xf32>
    %208 = vector.shape_cast %207 : vector<1xf32> to vector<1x1x1xf32>
    %209 = vector.extract %208[0, 0, 0] : f32 from vector<1x1x1xf32>
    %cst_176 = arith.constant 4.8828125E-4 : f32
    %210 = arith.mulf %209, %cst_176 : f32
    %211 = vector.broadcast %210 : f32 to vector<8x384xf32>
    %212 = arith.subf %203, %211 : vector<8x384xf32>
    %213 = vector.broadcast %0 : vector<1x384xf32> to vector<8x384xf32>
    %214 = arith.mulf %212, %213 : vector<8x384xf32>
    %215 = arith.mulf %214, %214 : vector<8x384xf32>
    %216 = vector.shape_cast %215 : vector<8x384xf32> to vector<1x8x384xf32>
    %cst_177 = arith.constant dense<0.000000e+00> : vector<1xf32>
    %217 = vector.multi_reduction <add>, %216, %cst_177 [1, 2] : vector<1x8x384xf32> to vector<1xf32>
    %218 = vector.shape_cast %217 : vector<1xf32> to vector<1x1x1xf32>
    %219 = vector.extract %218[0, 0, 0] : f32 from vector<1x1x1xf32>
    %cst_178 = arith.constant 4.8828125E-4 : f32
    %220 = arith.mulf %219, %cst_178 : f32
    %cst_179 = arith.constant 9.99999974E-6 : f32
    %221 = arith.addf %220, %cst_179 : f32
    %222 = math.rsqrt %221 : f32
    %223 = vector.broadcast %222 : f32 to vector<8x384xf32>
    %224 = arith.mulf %214, %223 : vector<8x384xf32>
    %225 = vector.broadcast %5 : vector<8x1xf32> to vector<8x384xf32>
    %226 = arith.mulf %224, %225 : vector<8x384xf32>
    %227 = vector.broadcast %6 : vector<8x1xf32> to vector<8x384xf32>
    %228 = arith.addf %226, %227 : vector<8x384xf32>
    %c0_180 = arith.constant 0 : index
    %c0_181 = arith.constant 0 : index
    %c0_182 = arith.constant 0 : index
    %229 = vector.load %arg9[%c0_180, %c0_181, %c0_182] : memref<2x8x384xf32, #tpu.memory_space<vmem>>, vector<1x8x384xf32>
    %230 = vector.shape_cast %229 : vector<1x8x384xf32> to vector<8x384xf32>
    %231 = vector.shape_cast %228 : vector<8x384xf32> to vector<1x8x384xf32>
    tpu.vector_store %arg9[%c0_180, %c0_181, %c0_182], %231 {strides = array<i32>} : memref<2x8x384xf32, #tpu.memory_space<vmem>>, vector<1x8x384xf32>,
    %232 = vector.extract_strided_slice %202 {offsets = [0, 384], sizes = [8, 384], strides = [1, 1]} : vector<8x768xf32> to vector<8x384xf32>
    %233 = vector.broadcast %0 : vector<1x384xf32> to vector<8x384xf32>
    %234 = arith.mulf %232, %233 : vector<8x384xf32>
    %235 = vector.shape_cast %234 : vector<8x384xf32> to vector<1x8x384xf32>
    %cst_183 = arith.constant dense<0.000000e+00> : vector<1xf32>
    %236 = vector.multi_reduction <add>, %235, %cst_183 [1, 2] : vector<1x8x384xf32> to vector<1xf32>
    %237 = vector.shape_cast %236 : vector<1xf32> to vector<1x1x1xf32>
    %238 = vector.extract %237[0, 0, 0] : f32 from vector<1x1x1xf32>
    %cst_184 = arith.constant 4.8828125E-4 : f32
    %239 = arith.mulf %238, %cst_184 : f32
    %240 = vector.broadcast %239 : f32 to vector<8x384xf32>
    %241 = arith.subf %232, %240 : vector<8x384xf32>
    %242 = vector.broadcast %0 : vector<1x384xf32> to vector<8x384xf32>
    %243 = arith.mulf %241, %242 : vector<8x384xf32>
    %244 = arith.mulf %243, %243 : vector<8x384xf32>
    %245 = vector.shape_cast %244 : vector<8x384xf32> to vector<1x8x384xf32>
    %cst_185 = arith.constant dense<0.000000e+00> : vector<1xf32>
    %246 = vector.multi_reduction <add>, %245, %cst_185 [1, 2] : vector<1x8x384xf32> to vector<1xf32>
    %247 = vector.shape_cast %246 : vector<1xf32> to vector<1x1x1xf32>
    %248 = vector.extract %247[0, 0, 0] : f32 from vector<1x1x1xf32>
    %cst_186 = arith.constant 4.8828125E-4 : f32
    %249 = arith.mulf %248, %cst_186 : f32
    %cst_187 = arith.constant 9.99999974E-6 : f32
    %250 = arith.addf %249, %cst_187 : f32
    %251 = math.rsqrt %250 : f32
    %252 = vector.broadcast %251 : f32 to vector<8x384xf32>
    %253 = arith.mulf %243, %252 : vector<8x384xf32>
    %254 = vector.broadcast %5 : vector<8x1xf32> to vector<8x384xf32>
    %255 = arith.mulf %253, %254 : vector<8x384xf32>
    %256 = vector.broadcast %6 : vector<8x1xf32> to vector<8x384xf32>
    %257 = arith.addf %255, %256 : vector<8x384xf32>
    %c1_188 = arith.constant 1 : index
    %c0_189 = arith.constant 0 : index
    %c0_190 = arith.constant 0 : index
    %258 = vector.load %arg9[%c1_188, %c0_189, %c0_190] : memref<2x8x384xf32, #tpu.memory_space<vmem>>, vector<1x8x384xf32>
    %259 = vector.shape_cast %258 : vector<1x8x384xf32> to vector<8x384xf32>
    %260 = vector.shape_cast %257 : vector<8x384xf32> to vector<1x8x384xf32>
    tpu.vector_store %arg9[%c1_188, %c0_189, %c0_190], %260 {strides = array<i32>} : memref<2x8x384xf32, #tpu.memory_space<vmem>>, vector<1x8x384xf32>,
    return
  }
  func.func @transform_0(%arg0: i32) -> (i32, i32, i32) {
    %c0_i32 = arith.constant 0 : i32
    %c0_i32_0 = arith.constant 0 : i32
    %c0_i32_1 = arith.constant 0 : i32
    return %arg0, %c0_i32, %c0_i32_0 : i32, i32, i32
  }
  func.func @transform_1(%arg0: i32) -> (i32, i32) {
    %c0_i32 = arith.constant 0 : i32
    %c0_i32_0 = arith.constant 0 : i32
    %c0_i32_1 = arith.constant 0 : i32
    return %c0_i32, %c0_i32_0 : i32, i32
  }
  func.func @transform_2(%arg0: i32) -> (i32, i32) {
    %c0_i32 = arith.constant 0 : i32
    %c0_i32_0 = arith.constant 0 : i32
    %c0_i32_1 = arith.constant 0 : i32
    return %c0_i32, %c0_i32_0 : i32, i32
  }
  func.func @transform_3(%arg0: i32) -> (i32, i32) {
    %c0_i32 = arith.constant 0 : i32
    %c0_i32_0 = arith.constant 0 : i32
    %c0_i32_1 = arith.constant 0 : i32
    return %c0_i32, %c0_i32_0 : i32, i32
  }
  func.func @transform_4(%arg0: i32) -> (i32, i32) {
    %c0_i32 = arith.constant 0 : i32
    %c0_i32_0 = arith.constant 0 : i32
    %c0_i32_1 = arith.constant 0 : i32
    return %c0_i32, %c0_i32_0 : i32, i32
  }
  func.func @transform_5(%arg0: i32) -> (i32, i32) {
    %c0_i32 = arith.constant 0 : i32
    %c0_i32_0 = arith.constant 0 : i32
    %c0_i32_1 = arith.constant 0 : i32
    return %c0_i32, %c0_i32_0 : i32, i32
  }
  func.func @transform_6(%arg0: i32) -> (i32, i32) {
    %c0_i32 = arith.constant 0 : i32
    %c0_i32_0 = arith.constant 0 : i32
    %c0_i32_1 = arith.constant 0 : i32
    return %c0_i32, %c0_i32_0 : i32, i32
  }
  func.func @transform_7(%arg0: i32) -> (i32, i32) {
    %c0_i32 = arith.constant 0 : i32
    %c0_i32_0 = arith.constant 0 : i32
    %c0_i32_1 = arith.constant 0 : i32
    return %c0_i32, %c0_i32_0 : i32, i32
  }
  func.func @transform_8(%arg0: i32) -> (i32, i32, i32) {
    %c0_i32 = arith.constant 0 : i32
    %c0_i32_0 = arith.constant 0 : i32
    %c0_i32_1 = arith.constant 0 : i32
    return %arg0, %c0_i32, %c0_i32_0 : i32, i32, i32
  }
}

</mosaic_0001>

<bundles_post_ra>
// kernel: tpu_custom_call.1
= control target key start
LH: loop header
LB: loop body
LE: loop exit
PB: predicated region body
PF: predicated region fallthrough
CT: control target
= control target key end

     0   :  { %13 = vsyncpa [#allocation5], 0  ;;  %s2439_s0 = inlined_call_operand.vmem [shape: f32[2,4,512], index: 0, kind: input, shape index: {}]   ;;  %s2440_s1 = inlined_call_operand.hbm [shape: f32[8,36], index: 1, kind: input, shape index: {}]   ;;  %s2441_s2 = inlined_call_operand.vmem [shape: f32[8,1], index: 2, kind: input, shape index: {}]   ;;  %s2442_s3 = inlined_call_operand.vmem [shape: f32[8,1], index: 3, kind: input, shape index: {}]   ;;  %s2443_s4 = inlined_call_operand.vmem [shape: f32[8,72], index: 4, kind: input, shape index: {}]   ;;  %s2444_s5 = inlined_call_operand.vmem [shape: f32[8,1], index: 5, kind: input, shape index: {}]   ;;  %s2445_s6 = inlined_call_operand.vmem [shape: f32[8,1], index: 6, kind: input, shape index: {}]   ;;  %s2446_s7 = inlined_call_operand.vmem [shape: f32[1,384], index: 7, kind: input, shape index: {}]   ;;  %s2447_s8 = inlined_call_operand.hbm [shape: f32[2,8,384], index: 8, kind: output, shape index: {}]  }
   0x1   :  { %14 = vsyncpa [#allocation6], 0  ;;  %s1767_s27 = smov [#allocation4]   ;;  %s1719_s9 = scalar_lea.hbm %s2440_s1, 128 }
   0x2   :  { %s23_s28 = sshll.u32 %s1767_s27, 4  ;;  %p1720_p0 = scmp.ne.s32.totalorder %s2440_s1, %s1719_s9  ;;  %s24_s28 = int_to_ptr.vmem [resolvable:$true] %s23_s28 }
   0x3   :  { %p1723_p1 = scmp.lt.u32.totalorder %s1719_s9, %s2440_s1 }
   0x5   :  { %p1725_p2 = pnand %p1723_p1, %p1720_p0 }
   0x7   :  { %1728 = shalt.err (!%p1725_p2)
}
   0x8   :  { %s1729_s14 = scalar_lea.vmem %s24_s28, 128  ;;  %p1734_p4 = scmp.lt.s32.totalorder %s24_s28, %s24_s28 }
   0x9   :  { %p1730_p3 = scmp.ne.s32.totalorder %s24_s28, %s1729_s14  ;;  %p1735_p5 = scmp.lt.s32.totalorder %s1729_s14, %s1729_s14 }
   0xb   :  { %p1736_p6 = por %p1735_p5, %p1734_p4 }
   0xd   :  { %p1737_p7 = pnand %p1736_p6, %p1730_p3 }
   0xf   :  { %1740 = shalt.err (!%p1737_p7)
}
  0x10   :  { %26 = dma.hbm_to_vmem [thread:$0]  %s2440_s1, 128, %s24_s28, [#allocation5]  }
  0x11   :  { %1763 = dma.done.wait [#allocation5], 128  }
  0x12   :  { %1764 = vsyncadd [#allocation5], 4294967168  ;;  %v1846_v0 = vld [vmem:[%s2439_s0 + $0x8] sm:$0xff]  ;;  %v1851_v1 = vld [vmem:[%s2439_s0] sm:$0xff]  ;;  %s1768_s23 = smov 126   ;;  %s1769_s1 = smov 127  }
  0x13   :  { %v1856_v2 = vld [vmem:[%s2439_s0 + $0x10] sm:$0xff]  ;;  %91 = vrot.lane.b32.xlu1 %v1846_v0, %s1768_s23  ;;  %65 = vrot.lane.b32.xlu0 %v1851_v1, %s1769_s1  ;;  %v85_v3 = vcombine.high %v1851_v1, %v1851_v1  ;;  %54 = vst [vmem:[#allocation2] sm:$0xf] %v1851_v1  ;;  %s1770_s24 = smov 110   ;;  %v110_v5 = vcombine.low %v1846_v0, %v1846_v0  ;;  %v50_v8 = vld [vmem:[%s2439_s0 + $0x8] sm:$0xf] }
  0x14   :  { %255 = vst [vmem:[#allocation2 + $0x18] sm:$0xf] %v1856_v2  ;;  %v1868_v4 = vcombine.high %v1856_v2, %v1856_v2  ;;  %v61_v6 = vcombine.low %v1851_v1, %v1851_v1  ;;  %v262_v7 = vcombine.low %v1856_v2, %v1856_v2  ;;  %56 = vst [vmem:[#allocation2 + $0x10] sm:$0xf] %v50_v8  ;;  %s1771_s27 = smov 109   ;;  %s1772_s28 = smov 108  }
  0x15   :  { %55 = vst [vmem:[#allocation2 + $0x8] sm:$0xf] %v85_v3  ;;  %v86_v9 = vcombine.high %v1846_v0, %v1846_v0  ;;  %s1773_s29 = smov 92   ;;  %s1774_s30 = smov 91   ;;  %v1776_v10 = vmov 0.0   ;;  %v1547_v11 = vld [vmem:[%s2439_s0 + $0x18] sm:$0xff] }
  0x16   :  { %256 = vst [vmem:[#allocation2 + $0x20] sm:$0xf] %v1868_v4  ;;  %s1775_s9 = smov 90   ;;  %559 = vmatprep.mubr.f32.mxu0 %v1776_v10  ;;  %630 = vmatprep.mubr.f32.mxu1 %v1776_v10  ;;  %v1545_v12 = vld [vmem:[%s2439_s0 + $0x18] sm:$0xf]  ;;  %v263_v13 = vcombine.low %v1547_v11, %v1547_v11  ;;  %v286_v14 = vcombine.high %v1547_v11, %v1547_v11  ;;  %vm95_vm0 = vcmask 1031168  }
  0x17   :  { %89 = vrot.lane.b32.xlu1 %v85_v3, %s1768_s23  ;;  %113 = vrot.lane.b32.xlu0 %v1851_v1, %s1770_s24  ;;  %257 = vst [vmem:[#allocation2 + $0x28] sm:$0xf] %v1545_v12  ;;  %vm119_vm1 = vcmask 900096   ;;  %vm71_vm2 = vcmask 1039360   ;;  %vm143_vm3 = vcmask 891904   ;;  %vm167_vm4 = vcmask 883712  }
  0x18   :  { %vm191_vm5 = vcmask 752640   ;;  %vm215_vm6 = vcmask 744448   ;;  %vm239_vm7 = vcmask 736256   ;;  %vm476_vm8 = vcmask 1043456   ;;  %s1779_s26 = smov 19  }
  0x19   :  { %vm472_vm9 = vcmask 293888   ;;  %vm857_vm10 = vcmask 7168   ;;  %vm803_vm11 = vcmask 154624   ;;  %vm823_vm12 = vcmask 146432  }
  0x1a   :  { %858 = vst.msk [vmem:[#allocation3 + $0x90] sm:$0xff] %vm857_vm10, %v1776_v10  ;;  %1059 = vst.msk [vmem:[#allocation3 + $0xa8] sm:$0xff] %vm857_vm10, %v1776_v10  ;;  %vm893_vm13 = vcmask 1048440   ;;  %vm910_vm14 = vcmask 1048432   ;;  %vm840_vm15 = vcmask 138240  }
  0x1b   :  { %115 = vrot.lane.b32.xlu1 %v110_v5, %s1770_s24  ;;  %67 = vrot.lane.b32.xlu0 %v110_v5, %s1769_s1  ;;  %804 = vst.msk [vmem:[#allocation3] sm:$0xff] %vm803_vm11, %v1776_v10  ;;  %1011 = vst.msk [vmem:[#allocation3 + $0x18] sm:$0xff] %vm803_vm11, %v1776_v10 }
  0x1c   :  { %824 = vst.msk [vmem:[#allocation3 + $0x30] sm:$0xff] %vm823_vm12, %v1776_v10  ;;  %1029 = vst.msk [vmem:[#allocation3 + $0x48] sm:$0xff] %vm823_vm12, %v1776_v10 }
  0x1d   :  { %894 = vst.msk [vmem:[#allocation3 + $0x130] sm:$0xff] %vm893_vm13, %v1776_v10  ;;  %1092 = vst.msk [vmem:[#allocation3 + $0x148] sm:$0xff] %vm893_vm13, %v1776_v10  ;;  %vm1191_vm13 = vcmask 588800  }
  0x1e   :  { %911 = vst.msk [vmem:[#allocation3 + $0x160] sm:$0xff] %vm910_vm14, %v1776_v10  ;;  %1107 = vst.msk [vmem:[#allocation3 + $0x178] sm:$0xff] %vm910_vm14, %v1776_v10 }
  0x1f   :  { %87 = vrot.lane.b32.xlu1 %v1851_v1, %s1768_s23  ;;  %63 = vrot.lane.b32.xlu0 %v61_v6, %s1769_s1  ;;  %841 = vst.msk [vmem:[#allocation3 + $0x60] sm:$0xff] %vm840_vm15, %v1776_v10  ;;  %1044 = vst.msk [vmem:[#allocation3 + $0x78] sm:$0xff] %vm840_vm15, %v1776_v10 }
  0x23   :  { %264 = vrot.lane.b32.xlu1 %v262_v7, %s1769_s1  ;;  %111 = vrot.lane.b32.xlu0 %v61_v6, %s1770_s24 }
  0x27   :  { %287 = vrot.lane.b32.xlu1 %v1856_v2, %s1768_s23  ;;  %266 = vrot.lane.b32.xlu0 %v1856_v2, %s1769_s1 }
  0x2b   :  { %310 = vrot.lane.b32.xlu1 %v262_v7, %s1770_s24  ;;  %289 = vrot.lane.b32.xlu0 %v1868_v4, %s1768_s23 }
  0x2f   :  { %69 = vrot.lane.b32.xlu1 %v1846_v0, %s1769_s1  ;;  %312 = vrot.lane.b32.xlu0 %v1856_v2, %s1770_s24 }
  0x33   :  { %117 = vrot.lane.b32.xlu1 %v1846_v0, %s1770_s24  ;;  %93 = vrot.lane.b32.xlu0 %v86_v9, %s1768_s23 }
  0x37   :  { %139 = vrot.lane.b32.xlu1 %v1846_v0, %s1771_s27  ;;  %137 = vrot.lane.b32.xlu0 %v85_v3, %s1771_s27 }
  0x3b   :  { %163 = vrot.lane.b32.xlu1 %v110_v5, %s1772_s28  ;;  %161 = vrot.lane.b32.xlu0 %v1851_v1, %s1772_s28 }
  0x3f   :  { %187 = vrot.lane.b32.xlu1 %v1846_v0, %s1773_s29  ;;  %185 = vrot.lane.b32.xlu0 %v85_v3, %s1773_s29 }
  0x43   :  { %211 = vrot.lane.b32.xlu1 %v110_v5, %s1774_s30  ;;  %209 = vrot.lane.b32.xlu0 %v1851_v1, %s1774_s30 }
  0x47   :  { %159 = vrot.lane.b32.xlu1 %v61_v6, %s1772_s28  ;;  %135 = vrot.lane.b32.xlu0 %v1851_v1, %s1771_s27 }
  0x4b   :  { %207 = vrot.lane.b32.xlu1 %v61_v6, %s1774_s30  ;;  %183 = vrot.lane.b32.xlu0 %v1851_v1, %s1773_s29 }
  0x4f   :  { %335 = vrot.lane.b32.xlu1 %v1868_v4, %s1771_s27  ;;  %333 = vrot.lane.b32.xlu0 %v1856_v2, %s1771_s27 }
  0x53   :  { %358 = vrot.lane.b32.xlu1 %v1856_v2, %s1772_s28  ;;  %356 = vrot.lane.b32.xlu0 %v262_v7, %s1772_s28 }
  0x57   :  { %381 = vrot.lane.b32.xlu1 %v1868_v4, %s1773_s29  ;;  %379 = vrot.lane.b32.xlu0 %v1856_v2, %s1773_s29 }
  0x5b   :  { %404 = vrot.lane.b32.xlu1 %v1856_v2, %s1774_s30  ;;  %402 = vrot.lane.b32.xlu0 %v262_v7, %s1774_s30 }
  0x5f   :  { %165 = vrot.lane.b32.xlu1 %v1846_v0, %s1772_s28  ;;  %141 = vrot.lane.b32.xlu0 %v86_v9, %s1771_s27 }
  0x63   :  { %213 = vrot.lane.b32.xlu1 %v1846_v0, %s1774_s30  ;;  %189 = vrot.lane.b32.xlu0 %v86_v9, %s1773_s29 }
  0x67   :  { %235 = vrot.lane.b32.xlu1 %v1846_v0, %s1775_s9  ;;  %233 = vrot.lane.b32.xlu0 %v85_v3, %s1775_s9 }
  0x6b   :  { %425 = vrot.lane.b32.xlu1 %v1856_v2, %s1775_s9  ;;  %231 = vrot.lane.b32.xlu0 %v1851_v1, %s1775_s9 }
  0x6f   :  { %237 = vrot.lane.b32.xlu1 %v86_v9, %s1775_s9  ;;  %427 = vrot.lane.b32.xlu0 %v1868_v4, %s1775_s9 }
  0x73   :  { %270 = vrot.lane.b32.xlu1 %v1547_v11, %s1769_s1  ;;  %268 = vrot.lane.b32.xlu0 %v263_v13, %s1769_s1 }
  0x77   :  { %293 = vrot.lane.b32.xlu1 %v286_v14, %s1768_s23  ;;  %291 = vrot.lane.b32.xlu0 %v1547_v11, %s1768_s23 }
  0x7b   :  { %316 = vrot.lane.b32.xlu1 %v1547_v11, %s1770_s24  ;;  %314 = vrot.lane.b32.xlu0 %v263_v13, %s1770_s24 }
  0x7f   :  { %339 = vrot.lane.b32.xlu1 %v286_v14, %s1771_s27  ;;  %337 = vrot.lane.b32.xlu0 %v1547_v11, %s1771_s27 }
  0x83   :  { %362 = vrot.lane.b32.xlu1 %v1547_v11, %s1772_s28  ;;  %360 = vrot.lane.b32.xlu0 %v263_v13, %s1772_s28  ;;  %s1780_s28 = smov 17  }
  0x85   :  { %v92_v15 = vpop.permute.xlu1 %91  ;;  %v66_v16 = vpop.permute.xlu0 %65 }
  0x87   :  { %385 = vrot.lane.b32.xlu1 %v286_v14, %s1773_s29  ;;  %383 = vrot.lane.b32.xlu0 %v1547_v11, %s1773_s29  ;;  %s1781_s29 = smov 18  }
  0x89   :  { %v90_v17 = vpop.permute.xlu1 %89  ;;  %v114_v18 = vpop.permute.xlu0 %113 }
  0x8a   :  { %v97_v19 = vsel %vm95_vm0, %v90_v17, %v92_v15 }
  0x8b   :  { %103 = vst [vmem:[#allocation2 + $0x38] sm:$0xf] %v97_v19  ;;  %408 = vrot.lane.b32.xlu1 %v1547_v11, %s1774_s30  ;;  %406 = vrot.lane.b32.xlu0 %v263_v13, %s1774_s30  ;;  %s1782_s30 = smov 111  }
  0x8d   :  { %v116_v20 = vpop.permute.xlu1 %115  ;;  %v68_v21 = vpop.permute.xlu0 %67 }
  0x8e   :  { %v121_v22 = vsel %vm119_vm1, %v114_v18, %v116_v20  ;;  %v73_v23 = vsel %vm71_vm2, %v66_v16, %v68_v21 }
  0x8f   :  { %127 = vst [vmem:[#allocation2 + $0x38] sm:$0xf0] %v121_v22  ;;  %79 = vst [vmem:[#allocation2 + $0x8] sm:$0xf0] %v73_v23  ;;  %429 = vrot.lane.b32.xlu0 %v1547_v11, %s1775_s9  ;;  %431 = vrot.lane.b32.xlu1 %v286_v14, %s1775_s9 }
  0x91   :  { %v88_v24 = vpop.permute.xlu1 %87  ;;  %v64_v25 = vpop.permute.xlu0 %63 }
  0x92   :  { %v96_v26 = vsel %vm95_vm0, %v88_v24, %v90_v17  ;;  %v72_v27 = vsel %vm71_vm2, %v64_v25, %v66_v16 }
  0x93   :  { %102 = vst [vmem:[#allocation2 + $0x30] sm:$0xf] %v96_v26  ;;  %78 = vst [vmem:[#allocation2] sm:$0xf0] %v72_v27 }
  0x95   :  { %v265_v28 = vpop.permute.xlu1 %264  ;;  %v112_v29 = vpop.permute.xlu0 %111 }
  0x96   :  { %v120_v30 = vsel %vm119_vm1, %v112_v29, %v114_v18  ;;  %v443_v31 = vld [vmem:[#allocation2 + $0x8] sm:$0xff]  ;;  %v449_v32 = vld [vmem:[#allocation2 + $0x38] sm:$0xff] }
  0x97   :  { %126 = vst [vmem:[#allocation2 + $0x30] sm:$0xf0] %v120_v30  ;;  %v1574_v33 = vpack.c.bf16 %v449_v32, %v443_v31 }
  0x99   :  { %v288_v34 = vpop.permute.xlu1 %287  ;;  %v1984_v35 = vpop.permute.xlu0 %266  ;;  %1575 = vmatprep.subr.bf16.mxu0 %v1574_v33 }
  0x9a   :  { %v272_v36 = vsel %vm71_vm2, %v265_v28, %v1984_v35  ;;  %v442_v40 = vld [vmem:[#allocation2] sm:$0xff] }
  0x9b   :  { %278 = vst [vmem:[#allocation2 + $0x18] sm:$0xf0] %v272_v36 }
  0x9d   :  { %v311_v37 = vpop.permute.xlu1 %310  ;;  %v1988_v38 = vpop.permute.xlu0 %289 }
  0x9e   :  { %v295_v39 = vsel %vm95_vm0, %v288_v34, %v1988_v38  ;;  %v448_v41 = vld [vmem:[#allocation2 + $0x30] sm:$0xff] }
  0x9f   :  { %301 = vst [vmem:[#allocation2 + $0x48] sm:$0xf] %v295_v39  ;;  %v1576_v42 = vpack.c.bf16 %v448_v41, %v442_v40 }
  0xa1   :  { %v70_v43 = vpop.permute.xlu1 %69  ;;  %v1992_v44 = vpop.permute.xlu0 %312  ;;  %1577 = vmatpush1.bf16.msra.mxu0 %v1576_v42 }
  0xa2   :  { %v74_v45 = vsel %vm71_vm2, %v68_v21, %v70_v43  ;;  %v318_v46 = vsel %vm119_vm1, %v311_v37, %v1992_v44  ;;  %v445_v54 = vld [vmem:[#allocation2 + $0x18] sm:$0xff] }
  0xa3   :  { %80 = vst [vmem:[#allocation2 + $0x10] sm:$0xf0] %v74_v45  ;;  %324 = vst [vmem:[#allocation2 + $0x48] sm:$0xf0] %v318_v46 }
  0xa5   :  { %v118_v47 = vpop.permute.xlu1 %117  ;;  %v94_v48 = vpop.permute.xlu0 %93 }
  0xa6   :  { %v122_v49 = vsel %vm119_vm1, %v116_v20, %v118_v47  ;;  %v98_v50 = vsel %vm95_vm0, %v92_v15, %v94_v48 }
  0xa7   :  { %128 = vst [vmem:[#allocation2 + $0x40] sm:$0xf0] %v122_v49  ;;  %104 = vst [vmem:[#allocation2 + $0x40] sm:$0xf] %v98_v50 }
  0xa9   :  { %v1999_v51 = vpop.permute.xlu1 %139  ;;  %v138_v52 = vpop.permute.xlu0 %137 }
  0xaa   :  { %v145_v53 = vsel %vm143_vm3, %v138_v52, %v1999_v51  ;;  %v451_v55 = vld [vmem:[#allocation2 + $0x48] sm:$0xff]  ;;  %v444_v60 = vld [vmem:[#allocation2 + $0x10] sm:$0xff] }
  0xab   :  { %151 = vst [vmem:[#allocation2 + $0x68] sm:$0xf] %v145_v53  ;;  %v1582_v56 = vpack.c.bf16 %v451_v55, %v445_v54 }
  0xad   :  { %v164_v57 = vpop.permute.xlu1 %163  ;;  %1583 = vmatprep.subr.bf16.mxu1 %v1582_v56  ;;  %v162_v58 = vpop.permute.xlu0 %161 }
  0xae   :  { %v169_v59 = vsel %vm167_vm4, %v162_v58, %v164_v57  ;;  %v450_v61 = vld [vmem:[#allocation2 + $0x40] sm:$0xff] }
  0xaf   :  { %175 = vst [vmem:[#allocation2 + $0x68] sm:$0xf0] %v169_v59  ;;  %v1584_v62 = vpack.c.bf16 %v450_v61, %v444_v60 }
  0xb1   :  { %v188_v63 = vpop.permute.xlu1 %187  ;;  %v186_v0 = vpop.permute.xlu0 %185  ;;  %1585 = vmatpush1.bf16.msra.mxu1 %v1584_v62  ;;  %v2039_v62 = vld [vmem:[#allocation4] sm:$0xff] }
  0xb2   :  { %v193_v1 = vsel %vm191_vm5, %v186_v0, %v188_v63 }
  0xb3   :  { %199 = vst [vmem:[#allocation2 + $0x98] sm:$0xf] %v193_v1 }
  0xb5   :  { %v212_v2 = vpop.permute.xlu1 %211  ;;  %v210_v3 = vpop.permute.xlu0 %209 }
  0xb6   :  { %v217_v4 = vsel %vm215_vm6, %v210_v3, %v212_v2  ;;  %v455_v14 = vld [vmem:[#allocation2 + $0x68] sm:$0xff] }
  0xb7   :  { %223 = vst [vmem:[#allocation2 + $0x98] sm:$0xf0] %v217_v4 }
  0xb9   :  { %v160_v5 = vpop.permute.xlu1 %159  ;;  %v136_v6 = vpop.permute.xlu0 %135 }
  0xba   :  { %v168_v7 = vsel %vm167_vm4, %v160_v5, %v162_v58  ;;  %v144_v8 = vsel %vm143_vm3, %v136_v6, %v138_v52 }
  0xbb   :  { %174 = vst [vmem:[#allocation2 + $0x60] sm:$0xf0] %v168_v7  ;;  %150 = vst [vmem:[#allocation2 + $0x60] sm:$0xf] %v144_v8 }
  0xbd   :  { %v208_v9 = vpop.permute.xlu1 %207  ;;  %v184_v11 = vpop.permute.xlu0 %183 }
  0xbe   :  { %v216_v12 = vsel %vm215_vm6, %v208_v9, %v210_v3  ;;  %v192_v13 = vsel %vm191_vm5, %v184_v11, %v186_v0  ;;  %v461_v15 = vld [vmem:[#allocation2 + $0x98] sm:$0xff] }
  0xbf   :  { %222 = vst [vmem:[#allocation2 + $0x90] sm:$0xf0] %v216_v12  ;;  %198 = vst [vmem:[#allocation2 + $0x90] sm:$0xf] %v192_v13  ;;  %v1578_v16 = vpack.c.bf16 %v461_v15, %v455_v14 }
  0xc1   :  { %v2010_v17 = vpop.permute.xlu1 %335  ;;  %v334_v18 = vpop.permute.xlu0 %333  ;;  %1579 = vmatprep.subr.bf16.mxu0 %v1578_v16 }
  0xc2   :  { %v341_v19 = vsel %vm143_vm3, %v334_v18, %v2010_v17  ;;  %v454_v23 = vld [vmem:[#allocation2 + $0x60] sm:$0xff] }
  0xc3   :  { %347 = vst [vmem:[#allocation2 + $0x78] sm:$0xf] %v341_v19 }
  0xc5   :  { %v2014_v20 = vpop.permute.xlu1 %358  ;;  %v357_v21 = vpop.permute.xlu0 %356 }
  0xc6   :  { %v364_v22 = vsel %vm167_vm4, %v357_v21, %v2014_v20  ;;  %v460_v24 = vld [vmem:[#allocation2 + $0x90] sm:$0xff] }
  0xc7   :  { %370 = vst [vmem:[#allocation2 + $0x78] sm:$0xf0] %v364_v22  ;;  %v1580_v25 = vpack.c.bf16 %v460_v24, %v454_v23 }
  0xc9   :  { %v2018_v26 = vpop.permute.xlu1 %381  ;;  %v380_v27 = vpop.permute.xlu0 %379  ;;  %1581 = vmatpush1.bf16.msra.mxu0 %v1580_v25 }
  0xca   :  { %v387_v28 = vsel %vm191_vm5, %v380_v27, %v2018_v26 }
  0xcb   :  { %393 = vst [vmem:[#allocation2 + $0xa8] sm:$0xf] %v387_v28 }
  0xcd   :  { %v2022_v29 = vpop.permute.xlu1 %404  ;;  %v403_v30 = vpop.permute.xlu0 %402 }
  0xce   :  { %v410_v31 = vsel %vm215_vm6, %v403_v30, %v2022_v29  ;;  %v457_v42 = vld [vmem:[#allocation2 + $0x78] sm:$0xff] }
  0xcf   :  { %416 = vst [vmem:[#allocation2 + $0xa8] sm:$0xf0] %v410_v31 }
  0xd1   :  { %v166_v32 = vpop.permute.xlu1 %165  ;;  %v142_v33 = vpop.permute.xlu0 %141 }
  0xd2   :  { %v170_v34 = vsel %vm167_vm4, %v164_v57, %v166_v32  ;;  %v146_v36 = vsel %vm143_vm3, %v1999_v51, %v142_v33 }
  0xd3   :  { %176 = vst [vmem:[#allocation2 + $0x70] sm:$0xf0] %v170_v34  ;;  %152 = vst [vmem:[#allocation2 + $0x70] sm:$0xf] %v146_v36 }
  0xd5   :  { %v214_v37 = vpop.permute.xlu1 %213  ;;  %v190_v39 = vpop.permute.xlu0 %189 }
  0xd6   :  { %v218_v40 = vsel %vm215_vm6, %v212_v2, %v214_v37  ;;  %v194_v41 = vsel %vm191_vm5, %v188_v63, %v190_v39  ;;  %v463_v43 = vld [vmem:[#allocation2 + $0xa8] sm:$0xff] }
  0xd7   :  { %224 = vst [vmem:[#allocation2 + $0xa0] sm:$0xf0] %v218_v40  ;;  %200 = vst [vmem:[#allocation2 + $0xa0] sm:$0xf] %v194_v41  ;;  %v1586_v45 = vpack.c.bf16 %v463_v43, %v457_v42 }
  0xd9   :  { %v236_v46 = vpop.permute.xlu1 %235  ;;  %v234_v47 = vpop.permute.xlu0 %233  ;;  %1587 = vmatprep.subr.bf16.mxu1 %v1586_v45 }
  0xda   :  { %v241_v48 = vsel %vm239_vm7, %v234_v47, %v236_v46  ;;  %v456_v52 = vld [vmem:[#allocation2 + $0x70] sm:$0xff] }
  0xdb   :  { %247 = vst [vmem:[#allocation2 + $0xc8] sm:$0xf] %v241_v48 }
  0xdd   :  { %v426_v49 = vpop.permute.xlu1 %425  ;;  %v232_v50 = vpop.permute.xlu0 %231 }
  0xde   :  { %v240_v51 = vsel %vm239_vm7, %v232_v50, %v234_v47  ;;  %v462_v53 = vld [vmem:[#allocation2 + $0xa0] sm:$0xff]  ;;  %v709_v47 = vlaneseq }
  0xdf   :  { %246 = vst [vmem:[#allocation2 + $0xc0] sm:$0xf] %v240_v51  ;;  %v1588_v54 = vpack.c.bf16 %v462_v53, %v456_v52  ;;  %v42_v50 = vld [vmem:[%s2446_s7] sm:$0x7] }
  0xe0   :  { %v710_v48 = vshrl.u32 %v709_v47, 7 }
  0xe1   :  { %v238_v55 = vpop.permute.xlu1 %237  ;;  %v2033_v56 = vpop.permute.xlu0 %427  ;;  %1589 = vmatpush1.bf16.msra.mxu1 %v1588_v54 }
  0xe2   :  { %v242_v57 = vsel %vm239_vm7, %v236_v46, %v238_v55  ;;  %v433_v58 = vsel %vm239_vm7, %v426_v49, %v2033_v56  ;;  %v467_v59 = vld [vmem:[#allocation2 + $0xc8] sm:$0xf]  ;;  %v711_v49 = vsub.s32 0, %v710_v48  ;;  %v715_v51 = vsub.s32 1, %v710_v48 }
  0xe3   :  { %248 = vst [vmem:[#allocation2 + $0xd0] sm:$0xf] %v242_v57  ;;  %439 = vst [vmem:[#allocation2 + $0xd8] sm:$0xf] %v433_v58  ;;  %1562 = vmatprep.subr.msk.mxu0 %vm476_vm8, %v467_v59  ;;  %v719_v54 = vsub.s32 2, %v710_v48 }
  0xe4   :  { %v2082_v52 = vrot.slane %v42_v50, %v711_v49  ;;  %v2084_v53 = vrot.slane %v42_v50, %v715_v51 }
  0xe5   :  { %v271_v60 = vpop.permute.xlu1 %270  ;;  %v269_v61 = vpop.permute.xlu0 %268  ;;  %v2088_v59 = vrot.slane %v42_v50, %v719_v54 }
  0xe6   :  { %v273_v63 = vsel %vm71_vm2, %v1984_v35, %v269_v61  ;;  %v274_v0 = vsel %vm71_vm2, %v269_v61, %v271_v60  ;;  %v466_v1 = vld [vmem:[#allocation2 + $0xc0] sm:$0xf] }
  0xe7   :  { %279 = vst [vmem:[#allocation2 + $0x20] sm:$0xf0] %v273_v63  ;;  %280 = vst [vmem:[#allocation2 + $0x28] sm:$0xf0] %v274_v0  ;;  %1563 = vmatpush1.msk.msra.mxu0 %vm476_vm8, %v466_v1 }
  0xe8   :  { %1564 = vmatmul.mubr.msk.f32.vlgmr.msra.gmra.mrb[0].mxu0 %vm472_vm9, %v2039_v62 }
  0xe9   :  { %v294_v2 = vpop.permute.xlu1 %293  ;;  %v292_v3 = vpop.permute.xlu0 %291  ;;  %701 = vmatprep.mubr.f32.mxu0 %v1776_v10 }
  0xea   :  { %v296_v4 = vsel %vm95_vm0, %v1988_v38, %v292_v3  ;;  %v297_v5 = vsel %vm95_vm0, %v292_v3, %v294_v2  ;;  %v469_v35 = vld [vmem:[#allocation2 + $0xd8] sm:$0xf]  ;;  %v468_v6 = vld [vmem:[#allocation2 + $0xd0] sm:$0xf]  ;;  %vm877_vm0 = vcmask 1048568  }
  0xeb   :  { %302 = vst [vmem:[#allocation2 + $0x50] sm:$0xf] %v296_v4  ;;  %303 = vst [vmem:[#allocation2 + $0x58] sm:$0xf] %v297_v5  ;;  %1565 = vmatprep.subr.msk.mxu1 %vm476_vm8, %v469_v35 }
  0xec   :  { %1566 = vmatpush1.msk.msra.mxu1 %vm476_vm8, %v468_v6  ;;  %878 = vst.msk [vmem:[#allocation3 + $0x100] sm:$0xff] %vm877_vm0, %v1776_v10  ;;  %1077 = vst.msk [vmem:[#allocation3 + $0x118] sm:$0xff] %vm877_vm0, %v1776_v10 }
  0xed   :  { %v317_v7 = vpop.permute.xlu1 %316  ;;  %v315_v8 = vpop.permute.xlu0 %314  ;;  %1567 = vmatmul.mubr.msk.f32.vlgmr.msra.gmra.mrb[0].mxu1 %vm472_vm9, %v2039_v62 }
  0xee   :  { %v319_v9 = vsel %vm119_vm1, %v1992_v44, %v315_v8  ;;  %v320_v38 = vsel %vm119_vm1, %v315_v8, %v317_v7  ;;  %1259 = vmatprep.mubr.f32.mxu1 %v1776_v10  ;;  %v447_v15 = vld [vmem:[#allocation2 + $0x28] sm:$0xff]  ;;  %v446_v22 = vld [vmem:[#allocation2 + $0x20] sm:$0xff] }
  0xef   :  { %325 = vst [vmem:[#allocation2 + $0x50] sm:$0xf0] %v319_v9  ;;  %326 = vst [vmem:[#allocation2 + $0x58] sm:$0xf0] %v320_v38 }
  0xf1   :  { %v340_v11 = vpop.permute.xlu1 %339  ;;  %v338_v12 = vpop.permute.xlu0 %337 }
  0xf2   :  { %v342_v13 = vsel %vm143_vm3, %v2010_v17, %v338_v12  ;;  %v343_v14 = vsel %vm143_vm3, %v338_v12, %v340_v11 }
  0xf3   :  { %348 = vst [vmem:[#allocation2 + $0x80] sm:$0xf] %v342_v13  ;;  %349 = vst [vmem:[#allocation2 + $0x88] sm:$0xf] %v343_v14 }
  0xf5   :  { %v363_v16 = vpop.permute.xlu1 %362  ;;  %v361_v18 = vpop.permute.xlu0 %360 }
  0xf6   :  { %v365_v44 = vsel %vm167_vm4, %v2014_v20, %v361_v18  ;;  %v366_v19 = vsel %vm167_vm4, %v361_v18, %v363_v16  ;;  %v453_v21 = vld [vmem:[#allocation2 + $0x58] sm:$0xff]  ;;  %v452_v23 = vld [vmem:[#allocation2 + $0x50] sm:$0xff]  ;;  %vm870_vm4 = vcmask 1047560  }
  0xf7   :  { %371 = vst [vmem:[#allocation2 + $0x80] sm:$0xf0] %v365_v44  ;;  %372 = vst [vmem:[#allocation2 + $0x88] sm:$0xf0] %v366_v19  ;;  %v1590_v24 = vpack.c.bf16 %v453_v21, %v447_v15  ;;  %v1592_v25 = vpack.c.bf16 %v452_v23, %v446_v22 }
  0xf9   :  { %v386_v17 = vpop.permute.xlu1 %385  ;;  %v384_v27 = vpop.permute.xlu0 %383  ;;  %1591 = vmatprep.subr.bf16.mxu0 %v1590_v24 }
  0xfa   :  { %v388_v28 = vsel %vm191_vm5, %v2018_v26, %v384_v27  ;;  %v389_v30 = vsel %vm191_vm5, %v384_v27, %v386_v17  ;;  %1593 = vmatpush1.bf16.msra.mxu0 %v1592_v25  ;;  %v1777_v27 = vmov 0   ;;  %vm819_vm5 = vcmask 1047704  }
  0xfb   :  { %394 = vst [vmem:[#allocation2 + $0xb0] sm:$0xf] %v388_v28  ;;  %395 = vst [vmem:[#allocation2 + $0xb8] sm:$0xf] %v389_v30  ;;  %1689 = vset.pattern.permute.xlu1 %v1777_v27  ;;  %v45_v28 = vld [vmem:[%s2441_s2] sm:$0xff]  ;;  %1690 = vset.pattern.permute.xlu0 %v1777_v27 }
  0xfd   :  { %v409_v20 = vpop.permute.xlu1 %408  ;;  %v407_v31 = vpop.permute.xlu0 %406 }
  0xfe   :  { %v411_v32 = vsel %vm215_vm6, %v2022_v29, %v407_v31  ;;  %v412_v33 = vsel %vm215_vm6, %v407_v31, %v409_v20  ;;  %v459_v39 = vld [vmem:[#allocation2 + $0x88] sm:$0xff]  ;;  %v458_v41 = vld [vmem:[#allocation2 + $0x80] sm:$0xff]  ;;  %vm836_vm6 = vcmask 1047696  }
  0xff   :  { %417 = vst [vmem:[#allocation2 + $0xb0] sm:$0xf0] %v411_v32  ;;  %418 = vst [vmem:[#allocation2 + $0xb8] sm:$0xf0] %v412_v33 }
 0x101   :  { %v430_v34 = vpop.permute.xlu0 %429  ;;  %v432_v36 = vpop.permute.xlu1 %431 }
 0x102   :  { %v434_v37 = vsel %vm239_vm7, %v2033_v56, %v430_v34  ;;  %v435_v26 = vsel %vm239_vm7, %v430_v34, %v432_v36  ;;  %vm901_vm7 = vcmask 908288  }
 0x103   :  { %440 = vst [vmem:[#allocation2 + $0xe0] sm:$0xf] %v434_v37  ;;  %441 = vst [vmem:[#allocation2 + $0xe8] sm:$0xf] %v435_v26 }
 0x106   :  { %v465_v40 = vld [vmem:[#allocation2 + $0xb8] sm:$0xff]  ;;  %v464_v42 = vld [vmem:[#allocation2 + $0xb0] sm:$0xff] }
 0x107   :  { %v1594_v43 = vpack.c.bf16 %v465_v40, %v459_v39  ;;  %v1596_v45 = vpack.c.bf16 %v464_v42, %v458_v41 }
 0x109   :  { %1595 = vmatprep.subr.bf16.mxu0 %v1594_v43 }
 0x10a   :  { %1597 = vmatpush1.bf16.msra.mxu0 %v1596_v45  ;;  %v471_v29 = vld [vmem:[#allocation2 + $0xe8] sm:$0xf]  ;;  %v470_v46 = vld [vmem:[#allocation2 + $0xe0] sm:$0xf] }
 0x10b   :  { %1568 = vmatprep.subr.msk.mxu0 %vm476_vm8, %v471_v29 }
 0x10e   :  { %1569 = vmatpush1.msk.msra.mxu0 %vm476_vm8, %v470_v46  ;;  %vm926_vm8 = vcmask 1048424  }
 0x10f   :  { %1570 = vmatmul.mubr.msk.f32.vlgmr.msra.gmra.mrb[2].mxu0 %vm472_vm9, %v2039_v62  ;;  %927 = vst.msk [vmem:[#allocation3 + $0x190] sm:$0xff] %vm926_vm8, %v1776_v10  ;;  %1122 = vst.msk [vmem:[#allocation3 + $0x1a8] sm:$0xff] %vm926_vm8, %v1776_v10  ;;  %vm853_vm9 = vcmask 1047688  }
 0x110   :  { %1330 = vmatprep.mubr.f32.mxu0 %v1776_v10 }
 0x1bb   :  { %v561_v55 = vpop.f32.mrb[0].mxu0 }
 0x1bc   :  { %v724_v56 = vmul.f32 %v2082_v52, %v561_v55  ;;  %v563_v57 = vpop.f32.mrb[1].mxu0 }
 0x1bd   :  { %v725_v58 = vmul.f32 %v2084_v53, %v563_v57 }
 0x1bf   :  { %v727_v60 = vadd.f32 %v725_v58, %v724_v56 }
 0x1c0   :  { %v632_v61 = vpop.f32.mrb[0].mxu1 }
 0x1c1   :  { %v726_v62 = vmul.f32 %v2088_v59, %v632_v61  ;;  %v2091_v63 = vpop.f32.mrb[1].mxu1 }
 0x1c2   :  { %v942_v2 = vmul.f32 %v2082_v52, %v2091_v63 }
 0x1c3   :  { %v728_v0 = vadd.f32 %v727_v60, %v726_v62 }
 0x1c5   :  { %729 = vadd.xlane.f32.xlu0 %v728_v0 }
 0x1e2   :  { %v2093_v1 = vpop.f32.mrb[2].mxu0 }
 0x1e3   :  { %v943_v3 = vmul.f32 %v2084_v53, %v2093_v1  ;;  %v2099_v4 = vpop.f32.mrb[3].mxu0 }
 0x1e4   :  { %v944_v5 = vmul.f32 %v2088_v59, %v2099_v4 }
 0x1e5   :  { %v945_v35 = vadd.f32 %v943_v3, %v942_v2 }
 0x1e7   :  { %v946_v6 = vadd.f32 %v945_v35, %v944_v5 }
 0x1e9   :  { %947 = vadd.xlane.f32.xlu0 %v946_v6 }
 0x252   :  { %v730_v7 = vpop.xlane.xlu0 %729 }
 0x253   :  { %v731_v8 = vrot.slane %v730_v7, 4 }
 0x255   :  { %v732_v9 = vadd.f32 %v731_v8, %v730_v7 }
 0x257   :  { %v733_v38 = vrot.slane %v732_v9, 2 }
 0x259   :  { %v734_v11 = vadd.f32 %v733_v38, %v732_v9 }
 0x25b   :  { %v735_v12 = vrot.slane %v734_v11, 1 }
 0x25d   :  { %v736_v13 = vadd.f32 %v735_v12, %v734_v11 }
 0x25f   :  { %1646 = vpush %v736_v13 }
 0x276   :  { %v948_v37 = vpop.xlane.xlu0 %947 }
 0x277   :  { %v949_v26 = vrot.slane %v948_v37, 4 }
 0x279   :  { %v950_v39 = vadd.f32 %v949_v26, %v948_v37 }
 0x27b   :  { %v951_v40 = vrot.slane %v950_v39, 2 }
 0x27d   :  { %v952_v42 = vadd.f32 %v951_v40, %v950_v39 }
 0x27f   :  { %v953_v43 = vrot.slane %v952_v42, 1 }
 0x281   :  { %v954_v29 = vadd.f32 %v953_v43, %v952_v42 }
 0x290   :  { %s1647_s7 = spop %1646 }
 0x291   :  { %s738_s15 = smul.f32 0.00048828125, %s1647_s7 }
 0x293   :  { %v739_v14 = vstv %s738_s15 }
 0x294   :  { %v740_v15 = vsub.f32 %v561_v55, %v739_v14  ;;  %v741_v16 = vsub.f32 %v563_v57, %v739_v14  ;;  %v742_v18 = vsub.f32 %v632_v61, %v739_v14  ;;  %v46_v61 = vld [vmem:[%s2442_s3] sm:$0xff]  ;;  %s1778_s3 = smov 1  }
 0x296   :  { %v743_v44 = vmul.f32 %v740_v15, %v2082_v52  ;;  %v744_v19 = vmul.f32 %v741_v16, %v2084_v53  ;;  %v745_v21 = vmul.f32 %v742_v18, %v2088_v59 }
 0x298   :  { %v746_v22 = vmul.f32 %v743_v44, %v743_v44  ;;  %v747_v23 = vmul.f32 %v744_v19, %v744_v19  ;;  %v748_v24 = vmul.f32 %v745_v21, %v745_v21 }
 0x29a   :  { %v749_v25 = vadd.f32 %v747_v23, %v746_v22 }
 0x29c   :  { %v750_v17 = vadd.f32 %v749_v25, %v748_v24 }
 0x29e   :  { %751 = vadd.xlane.f32.xlu1 %v750_v17 }
 0x2af   :  { %771 = vperm.xlu1 %1689, %v45_v28  }
 0x32b   :  { %v752_v30 = vpop.xlane.xlu1 %751 }
 0x32c   :  { %v753_v20 = vrot.slane %v752_v30, 4 }
 0x32e   :  { %v754_v31 = vadd.f32 %v753_v20, %v752_v30 }
 0x32f   :  { %v2130_v5 = vpop.permute.xlu1 %771 }
 0x330   :  { %v755_v32 = vrot.slane %v754_v31, 2 }
 0x332   :  { %v756_v33 = vadd.f32 %v755_v32, %v754_v31 }
 0x334   :  { %v757_v34 = vrot.slane %v756_v33, 1 }
 0x336   :  { %v758_v36 = vadd.f32 %v757_v34, %v756_v33 }
 0x338   :  { %1648 = vpush %v758_v36 }
 0x369   :  { %s1649_s18 = spop %1648 }
 0x36a   :  { %s760_s19 = smul.f32 0.00048828125, %s1649_s18 }
 0x36c   :  { %s761_s20 = sadd.f32 1e-05, %s760_s19 }
 0x36e   :  { %v762_v41 = vstv %s761_s20 }
 0x36f   :  { %1699 = vrsqrt.f32 %v762_v41 }
 0x379   :  { %v1700_v45 = vpop.eup %1699 }
 0x37a   :  { %1650 = vpush %v1700_v45 }
 0x37b   :  { %1652 = vpush %v954_v29 }
 0x3ab   :  { %s1651_s2 = spop %1650 }
 0x3ac   :  { %s1653_s21 = spop %1652  ;;  %v765_v62 = vstv %s1651_s2 }
 0x3ad   :  { %s956_s22 = smul.f32 0.00048828125, %s1653_s21  ;;  %v767_v2 = vmul.f32 %v765_v62, %v744_v19  ;;  %v768_v3 = vmul.f32 %v765_v62, %v745_v21 }
 0x3af   :  { %v957_v46 = vstv %s956_s22  ;;  %v775_v7 = vmul.f32 %v2130_v5, %v767_v2  ;;  %v776_v8 = vmul.f32 %v2130_v5, %v768_v3  ;;  %s1783_s22 = smov [#allocation7]  }
 0x3b0   :  { %v958_v47 = vsub.f32 %v2091_v63, %v957_v46  ;;  %v959_v48 = vsub.f32 %v2093_v1, %v957_v46  ;;  %v960_v49 = vsub.f32 %v2099_v4, %v957_v46  ;;  %v766_v1 = vmul.f32 %v765_v62, %v743_v44  ;;  %s1532_s23 = sshll.u32 %s1783_s22, 4  ;;  %s1533_s23 = int_to_ptr.vmem [resolvable:$true] %s1532_s23 }
 0x3b1   :  { %s1741_s25 = scalar_lea.vmem %s1533_s23, 768  ;;  %p1746_p9 = scmp.lt.s32.totalorder %s1533_s23, %s1533_s23 }
 0x3b2   :  { %v2113_v50 = vmul.f32 %v958_v47, %v2082_v52  ;;  %v2116_v51 = vmul.f32 %v959_v48, %v2084_v53  ;;  %v2119_v54 = vmul.f32 %v960_v49, %v2088_v59  ;;  %v774_v6 = vmul.f32 %v2130_v5, %v766_v1  ;;  %p1742_p8 = scmp.ne.s32.totalorder %s1533_s23, %s1741_s25  ;;  %p1747_p10 = scmp.lt.s32.totalorder %s1741_s25, %s1741_s25 }
 0x3b4   :  { %v964_v55 = vmul.f32 %v2113_v50, %v2113_v50  ;;  %v965_v56 = vmul.f32 %v2116_v51, %v2116_v51  ;;  %v966_v57 = vmul.f32 %v2119_v54, %v2119_v54  ;;  %p1748_p11 = por %p1747_p10, %p1746_p9 }
 0x3b6   :  { %v967_v58 = vadd.f32 %v965_v56, %v964_v55  ;;  %p1749_p12 = pnand %p1748_p11, %p1742_p8 }
 0x3b8   :  { %v968_v60 = vadd.f32 %v967_v58, %v966_v57 }
 0x3ba   :  { %969 = vadd.xlane.f32.xlu0 %v968_v60 }
 0x3d0   :  { %779 = vperm.xlu0 %1690, %v46_v61  }
 0x447   :  { %v970_v63 = vpop.xlane.xlu0 %969 }
 0x448   :  { %v971_v0 = vrot.slane %v970_v63, 4 }
 0x44a   :  { %v972_v4 = vadd.f32 %v971_v0, %v970_v63 }
 0x44c   :  { %v973_v35 = vrot.slane %v972_v4, 2 }
 0x44e   :  { %v974_v9 = vadd.f32 %v973_v35, %v972_v4 }
 0x44f   :  { %v2135_v38 = vpop.permute.xlu0 %779 }
 0x450   :  { %v782_v11 = vadd.f32 %v2135_v38, %v774_v6  ;;  %v783_v12 = vadd.f32 %v2135_v38, %v775_v7  ;;  %v784_v13 = vadd.f32 %v2135_v38, %v776_v8  ;;  %v975_v14 = vrot.slane %v974_v9, 1 }
 0x452   :  { %v788_v15 = vmul.f32 0.70710677, %v782_v11  ;;  %v789_v16 = vmul.f32 0.70710677, %v783_v12  ;;  %v790_v18 = vmul.f32 0.70710677, %v784_v13  ;;  %v976_v44 = vadd.f32 %v975_v14, %v974_v9 }
 0x453   :  { %v785_v22 = vmul.f32 0.5, %v782_v11  ;;  %v786_v25 = vmul.f32 0.5, %v783_v12  ;;  %v787_v27 = vmul.f32 0.5, %v784_v13 }
 0x454   :  { %1701 = verf.f32 %v788_v15  ;;  %1654 = vpush %v976_v44 }
 0x455   :  { %1703 = verf.f32 %v789_v16 }
 0x456   :  { %1705 = verf.f32 %v790_v18 }
 0x45e   :  { %v1702_v19 = vpop.eup %1701 }
 0x45f   :  { %v1704_v21 = vpop.eup %1703  ;;  %v794_v23 = vadd.f32 1.0, %v1702_v19 }
 0x460   :  { %v1706_v24 = vpop.eup %1705  ;;  %v795_v17 = vadd.f32 1.0, %v1704_v21 }
 0x461   :  { %v796_v28 = vadd.f32 1.0, %v1706_v24  ;;  %v797_v30 = vmul.f32 %v794_v23, %v785_v22 }
 0x462   :  { %v798_v20 = vmul.f32 %v795_v17, %v786_v25 }
 0x463   :  { %v799_v31 = vmul.f32 %v796_v28, %v787_v27  ;;  %v2153_v32 = vmul.f32 %v797_v30, %v2082_v52 }
 0x464   :  { %v2156_v33 = vmul.f32 %v798_v20, %v2084_v53 }
 0x465   :  { %v2159_v34 = vmul.f32 %v799_v31, %v2088_v59  ;;  %859 = vrot.lane.b32.xlu0 %v2153_v32, %s1778_s3  ;;  %808 = vrot.lane.b32.xlu1 %v2153_v32, %s1779_s26 }
 0x469   :  { %846 = vrot.lane.b32.xlu0 %v2159_v34, %s1780_s28  ;;  %810 = vrot.lane.b32.xlu1 %v2156_v33, %s1779_s26 }
 0x46d   :  { %881 = vrot.lane.b32.xlu0 %v2156_v33, %s1769_s1  ;;  %825 = vrot.lane.b32.xlu1 %v2153_v32, %s1781_s29 }
 0x471   :  { %879 = vrot.lane.b32.xlu0 %v2153_v32, %s1769_s1  ;;  %827 = vrot.lane.b32.xlu1 %v2156_v33, %s1781_s29 }
 0x475   :  { %899 = vrot.lane.b32.xlu0 %v2159_v34, %s1782_s30  ;;  %812 = vrot.lane.b32.xlu1 %v2159_v34, %s1779_s26 }
 0x479   :  { %916 = vrot.lane.b32.xlu0 %v2159_v34, %s1770_s24  ;;  %829 = vrot.lane.b32.xlu1 %v2159_v34, %s1781_s29 }
 0x47d   :  { %912 = vrot.lane.b32.xlu0 %v2153_v32, %s1770_s24  ;;  %842 = vrot.lane.b32.xlu1 %v2153_v32, %s1780_s28 }
 0x481   :  { %844 = vrot.lane.b32.xlu1 %v2156_v33, %s1780_s28 }
 0x485   :  { %861 = vrot.lane.b32.xlu1 %v2156_v33, %s1778_s3  ;;  %s1655_s9 = spop %1654 }
 0x486   :  { %s978_s10 = smul.f32 0.00048828125, %s1655_s9 }
 0x488   :  { %s979_s11 = sadd.f32 1e-05, %s978_s10 }
 0x489   :  { %863 = vrot.lane.b32.xlu1 %v2159_v34, %s1778_s3 }
 0x48a   :  { %v980_v36 = vstv %s979_s11 }
 0x48b   :  { %1707 = vrsqrt.f32 %v980_v36 }
 0x48d   :  { %883 = vrot.lane.b32.xlu1 %v2159_v34, %s1769_s1 }
 0x491   :  { %897 = vrot.lane.b32.xlu1 %v2156_v33, %s1782_s30 }
 0x495   :  { %914 = vrot.lane.b32.xlu1 %v2156_v33, %s1770_s24  ;;  %v1708_v37 = vpop.eup %1707 }
 0x496   :  { %1656 = vpush %v1708_v37 }
 0x499   :  { %895 = vrot.lane.b32.xlu1 %v2153_v32, %s1782_s30 }
 0x49d   :  { %930 = vrot.lane.b32.xlu1 %v2156_v33, %s1771_s27 }
 0x4c7   :  { %s1657_s12 = spop %1656 }
 0x4c8   :  { %v983_v26 = vstv %s1657_s12 }
 0x4c9   :  { %v984_v39 = vmul.f32 %v983_v26, %v2113_v50  ;;  %v985_v40 = vmul.f32 %v983_v26, %v2116_v51  ;;  %v986_v41 = vmul.f32 %v983_v26, %v2119_v54 }
 0x4cb   :  { %v987_v42 = vmul.f32 %v984_v39, %v2130_v5  ;;  %v988_v43 = vmul.f32 %v985_v40, %v2130_v5  ;;  %v989_v45 = vmul.f32 %v986_v41, %v2130_v5 }
 0x4cd   :  { %v990_v29 = vadd.f32 %v987_v42, %v2135_v38  ;;  %v991_v46 = vadd.f32 %v988_v43, %v2135_v38  ;;  %v992_v47 = vadd.f32 %v989_v45, %v2135_v38 }
 0x4cf   :  { %v996_v48 = vmul.f32 0.70710677, %v990_v29  ;;  %v997_v49 = vmul.f32 0.70710677, %v991_v46  ;;  %v998_v55 = vmul.f32 0.70710677, %v992_v47 }
 0x4d0   :  { %v993_v61 = vmul.f32 0.5, %v990_v29  ;;  %v994_v0 = vmul.f32 0.5, %v991_v46  ;;  %v995_v2 = vmul.f32 0.5, %v992_v47 }
 0x4d1   :  { %1709 = verf.f32 %v996_v48 }
 0x4d2   :  { %1711 = verf.f32 %v997_v49 }
 0x4d3   :  { %1713 = verf.f32 %v998_v55 }
 0x4d7   :  { %v2224_v50 = vpop.permute.xlu0 %859  ;;  %v809_v51 = vpop.permute.xlu1 %808 }
 0x4d8   :  { %871 = vst.msk [vmem:[#allocation3 + $0x90] sm:$0xff] %vm870_vm4, %v2224_v50 }
 0x4d9   :  { %820 = vst.msk [vmem:[#allocation3] sm:$0xff] %vm819_vm5, %v809_v51 }
 0x4db   :  { %v847_v54 = vpop.permute.xlu0 %846  ;;  %v811_v56 = vpop.permute.xlu1 %810 }
 0x4dc   :  { %v1710_v57 = vpop.eup %1709  ;;  %v814_v58 = vsel %vm803_vm11, %v809_v51, %v811_v56 }
 0x4dd   :  { %v1712_v60 = vpop.eup %1711  ;;  %v1002_v62 = vadd.f32 1.0, %v1710_v57 }
 0x4de   :  { %v1714_v63 = vpop.eup %1713  ;;  %v1003_v1 = vadd.f32 1.0, %v1712_v60 }
 0x4df   :  { %v1004_v3 = vadd.f32 1.0, %v1714_v63  ;;  %v1005_v4 = vmul.f32 %v1002_v62, %v993_v61  ;;  %v2230_v5 = vpop.permute.xlu0 %881  ;;  %v826_v35 = vpop.permute.xlu1 %825  ;;  %v1155_v39 = vld [vmem:[#allocation3 + $0x90] sm:$0xff] }
 0x4e0   :  { %v1006_v6 = vmul.f32 %v1003_v1, %v994_v0  ;;  %837 = vst.msk [vmem:[#allocation3 + $0x30] sm:$0xff] %vm836_vm6, %v826_v35  ;;  %v1137_v44 = vld [vmem:[#allocation3] sm:$0xff] }
 0x4e1   :  { %v1007_v7 = vmul.f32 %v1004_v3, %v995_v2  ;;  %v2234_v8 = vmul.f32 %v1005_v4, %v2082_v52 }
 0x4e2   :  { %v2237_v9 = vmul.f32 %v1006_v6, %v2084_v53 }
 0x4e3   :  { %v2240_v38 = vmul.f32 %v1007_v7, %v2088_v59  ;;  %1030 = vrot.lane.b32.xlu1 %v2234_v8, %s1781_s29  ;;  %1015 = vrot.lane.b32.xlu0 %v2234_v8, %s1779_s26  ;;  %v880_v11 = vpop.permute.xlu0 %879  ;;  %v828_v12 = vpop.permute.xlu1 %827 }
 0x4e4   :  { %v885_v13 = vsel %vm71_vm2, %v880_v11, %v2230_v5  ;;  %v831_v14 = vsel %vm823_vm12, %v826_v35, %v828_v12 }
 0x4e5   :  { %v1598_v15 = vpack.c.bf16 %v831_v14, %v814_v58  ;;  %v1608_v48 = vpack.c.bf16 %v885_v13, %v2153_v32 }
 0x4e7   :  { %1060 = vrot.lane.b32.xlu1 %v2234_v8, %s1778_s3  ;;  %1045 = vrot.lane.b32.xlu0 %v2234_v8, %s1780_s28  ;;  %v900_v16 = vpop.permute.xlu0 %899  ;;  %v813_v18 = vpop.permute.xlu1 %812  ;;  %v1143_v19 = vld [vmem:[#allocation3 + $0x30] sm:$0xff] }
 0x4e8   :  { %909 = vst.msk [vmem:[#allocation3 + $0x130] sm:$0xff] %vm901_vm7, %v900_v16  ;;  %v2255_v21 = vsel %vm803_vm11, %v811_v56, %v813_v18  ;;  %1599 = vmatprep.subr.bf16.mxu1 %v1598_v15  ;;  %v1600_v22 = vpack.c.bf16 %v1143_v19, %v1137_v44 }
 0x4ea   :  { %1601 = vmatpush1.bf16.msra.mxu1 %v1600_v22 }
 0x4eb   :  { %1078 = vrot.lane.b32.xlu1 %v2234_v8, %s1769_s1  ;;  %1080 = vrot.lane.b32.xlu0 %v2237_v9, %s1769_s1  ;;  %v917_v23 = vpop.permute.xlu0 %916  ;;  %v830_v24 = vpop.permute.xlu1 %829 }
 0x4ec   :  { %925 = vst.msk [vmem:[#allocation3 + $0x160] sm:$0xff] %vm119_vm1, %v917_v23  ;;  %v2265_v25 = vsel %vm823_vm12, %v828_v12, %v830_v24 }
 0x4ed   :  { %v1616_v17 = vpack.c.bf16 %v2265_v25, %v2255_v21 }
 0x4ef   :  { %1093 = vrot.lane.b32.xlu1 %v2234_v8, %s1782_s30  ;;  %1095 = vrot.lane.b32.xlu0 %v2237_v9, %s1782_s30  ;;  %v843_v27 = vpop.permute.xlu1 %842  ;;  %v913_v55 = vpop.permute.xlu0 %912 }
 0x4f0   :  { %854 = vst.msk [vmem:[#allocation3 + $0x60] sm:$0xff] %vm853_vm9, %v843_v27 }
 0x4f3   :  { %1108 = vrot.lane.b32.xlu1 %v2234_v8, %s1770_s24  ;;  %1110 = vrot.lane.b32.xlu0 %v2237_v9, %s1770_s24  ;;  %v845_v28 = vpop.permute.xlu1 %844  ;;  %v1181_v22 = vld [vmem:[#allocation3 + $0x160] sm:$0xff] }
 0x4f4   :  { %v848_v30 = vsel %vm840_vm15, %v843_v27, %v845_v28  ;;  %v2280_v20 = vsel %vm840_vm15, %v845_v28, %v847_v54  ;;  %v2363_v27 = vld [vmem:[%s2443_s4] sm:$0xff] }
 0x4f7   :  { %928 = vrot.lane.b32.xlu1 %v2153_v32, %s1771_s27  ;;  %932 = vrot.lane.b32.xlu0 %v2159_v34, %s1771_s27  ;;  %v862_v31 = vpop.permute.xlu1 %861  ;;  %v1149_v37 = vld [vmem:[#allocation3 + $0x60] sm:$0xff] }
 0x4f8   :  { %v865_v36 = vsel %vm857_vm10, %v2224_v50, %v862_v31  ;;  %v1604_v41 = vpack.c.bf16 %v1155_v39, %v1149_v37 }
 0x4f9   :  { %v1602_v26 = vpack.c.bf16 %v865_v36, %v848_v30 }
 0x4fb   :  { %1125 = vrot.lane.b32.xlu1 %v2237_v9, %s1771_s27  ;;  %1123 = vrot.lane.b32.xlu0 %v2234_v8, %s1771_s27  ;;  %v864_v40 = vpop.permute.xlu1 %863 }
 0x4fc   :  { %v866_v42 = vsel %vm857_vm10, %v862_v31, %v864_v40  ;;  %1603 = vmatprep.subr.bf16.mxu1 %v1602_v26 }
 0x4fd   :  { %1605 = vmatpush1.bf16.msra.mxu1 %v1604_v41  ;;  %v1620_v43 = vpack.c.bf16 %v866_v42, %v2280_v20 }
 0x4ff   :  { %1019 = vrot.lane.b32.xlu1 %v2240_v38, %s1779_s26  ;;  %1017 = vrot.lane.b32.xlu0 %v2237_v9, %s1779_s26  ;;  %v884_v45 = vpop.permute.xlu1 %883 }
 0x500   :  { %v886_v29 = vsel %vm71_vm2, %v2230_v5, %v884_v45  ;;  %892 = vst.msk [vmem:[#allocation3 + $0x100] sm:$0xff] %vm71_vm2, %v884_v45 }
 0x501   :  { %v1606_v46 = vpack.c.bf16 %v886_v29, %v2156_v33 }
 0x503   :  { %1034 = vrot.lane.b32.xlu1 %v2240_v38, %s1781_s29  ;;  %1032 = vrot.lane.b32.xlu0 %v2237_v9, %s1781_s29  ;;  %v898_v47 = vpop.permute.xlu1 %897 }
 0x504   :  { %v903_v49 = vsel %vm901_vm7, %v898_v47, %v900_v16  ;;  %1607 = vmatprep.subr.bf16.mxu1 %v1606_v46 }
 0x505   :  { %1609 = vmatpush1.bf16.msra.mxu1 %v1608_v48 }
 0x507   :  { %1049 = vrot.lane.b32.xlu1 %v2240_v38, %s1780_s28  ;;  %1047 = vrot.lane.b32.xlu0 %v2237_v9, %s1780_s28  ;;  %v915_v33 = vpop.permute.xlu1 %914  ;;  %v1169_v15 = vld [vmem:[#allocation3 + $0x100] sm:$0xff] }
 0x508   :  { %v918_v50 = vsel %vm119_vm1, %v913_v55, %v915_v33  ;;  %v919_v51 = vsel %vm119_vm1, %v915_v33, %v917_v23  ;;  %v1624_v19 = vpack.c.bf16 %v1169_v15, %v2159_v34 }
 0x509   :  { %v1610_v54 = vpack.c.bf16 %v919_v51, %v903_v49 }
 0x50b   :  { %1064 = vrot.lane.b32.xlu1 %v2240_v38, %s1778_s3  ;;  %1062 = vrot.lane.b32.xlu0 %v2237_v9, %s1778_s3  ;;  %v896_v32 = vpop.permute.xlu1 %895 }
 0x50c   :  { %v902_v56 = vsel %vm901_vm7, %v896_v32, %v898_v47  ;;  %1611 = vmatprep.subr.bf16.mxu1 %v1610_v54 }
 0x50d   :  { %v1612_v57 = vpack.c.bf16 %v918_v50, %v902_v56 }
 0x50f   :  { %1097 = vrot.lane.b32.xlu1 %v2240_v38, %s1782_s30  ;;  %1082 = vrot.lane.b32.xlu0 %v2240_v38, %s1769_s1  ;;  %v931_v58 = vpop.permute.xlu1 %930 }
 0x510   :  { %1613 = vmatpush1.bf16.msra.mxu1 %v1612_v57 }
 0x513   :  { %1127 = vrot.lane.b32.xlu1 %v2240_v38, %s1771_s27  ;;  %1112 = vrot.lane.b32.xlu0 %v2240_v38, %s1770_s24 }
 0x555   :  { %v2327_v60 = vpop.permute.xlu1 %1030  ;;  %v1016_v61 = vpop.permute.xlu0 %1015 }
 0x556   :  { %1041 = vst.msk [vmem:[#allocation3 + $0x48] sm:$0xff] %vm836_vm6, %v2327_v60 }
 0x557   :  { %1026 = vst.msk [vmem:[#allocation3 + $0x18] sm:$0xff] %vm819_vm5, %v1016_v61 }
 0x559   :  { %v2332_v62 = vpop.permute.xlu1 %1060  ;;  %v2334_v63 = vpop.permute.xlu0 %1045 }
 0x55a   :  { %1071 = vst.msk [vmem:[#allocation3 + $0xa8] sm:$0xff] %vm870_vm4, %v2332_v62 }
 0x55b   :  { %1056 = vst.msk [vmem:[#allocation3 + $0x78] sm:$0xff] %vm853_vm9, %v2334_v63 }
 0x55d   :  { %v1079_v0 = vpop.permute.xlu1 %1078  ;;  %v2340_v1 = vpop.permute.xlu0 %1080  ;;  %v1146_v3 = vld [vmem:[#allocation3 + $0x48] sm:$0xff] }
 0x55e   :  { %v1140_v2 = vld [vmem:[#allocation3 + $0x18] sm:$0xff]  ;;  %v1084_v4 = vsel %vm71_vm2, %v1079_v0, %v2340_v1 }
 0x55f   :  { %v1614_v5 = vpack.c.bf16 %v1146_v3, %v1140_v2  ;;  %v1622_v14 = vpack.c.bf16 %v1084_v4, %v2234_v8 }
 0x561   :  { %1615 = vmatprep.subr.bf16.mxu0 %v1614_v5  ;;  %v1094_v35 = vpop.permute.xlu1 %1093  ;;  %v2347_v6 = vpop.permute.xlu0 %1095  ;;  %v1158_v11 = vld [vmem:[#allocation3 + $0xa8] sm:$0xff] }
 0x562   :  { %1617 = vmatpush1.bf16.msra.mxu0 %v1616_v17  ;;  %v1152_v7 = vld [vmem:[#allocation3 + $0x78] sm:$0xff]  ;;  %v1099_v12 = vsel %vm901_vm7, %v1094_v35, %v2347_v6  ;;  %v1175_v17 = vld [vmem:[#allocation3 + $0x130] sm:$0xff] }
 0x563   :  { %v1618_v13 = vpack.c.bf16 %v1158_v11, %v1152_v7  ;;  %v1628_v34 = vpack.c.bf16 %v1181_v22, %v1175_v17 }
 0x565   :  { %1619 = vmatprep.subr.bf16.mxu0 %v1618_v13  ;;  %v1109_v16 = vpop.permute.xlu1 %1108  ;;  %v2352_v18 = vpop.permute.xlu0 %1110 }
 0x566   :  { %1621 = vmatpush1.bf16.msra.mxu0 %v1620_v43  ;;  %v1114_v44 = vsel %vm119_vm1, %v1109_v16, %v2352_v18 }
 0x567   :  { %1623 = vmatprep.subr.bf16.mxu0 %v1622_v14  ;;  %v1626_v21 = vpack.c.bf16 %v1114_v44, %v1099_v12 }
 0x569   :  { %v929_v23 = vpop.permute.xlu1 %928  ;;  %v933_v24 = vpop.permute.xlu0 %932 }
 0x56a   :  { %1625 = vmatpush1.bf16.msra.mxu0 %v1624_v19  ;;  %v934_v25 = vsel %vm143_vm3, %v929_v23, %v931_v58  ;;  %v935_v8 = vsel %vm143_vm3, %v931_v58, %v933_v24  ;;  %941 = vst.msk [vmem:[#allocation3 + $0x190] sm:$0xff] %vm143_vm3, %v933_v24 }
 0x56b   :  { %1627 = vmatprep.subr.bf16.mxu0 %v1626_v21  ;;  %1211 = vmatprep.subr.mxu1 %v935_v8 }
 0x56c   :  { %1212 = vmatpush1.msra.mxu1 %v934_v25 }
 0x56d   :  { %v1126_v28 = vpop.permute.xlu1 %1125  ;;  %v1124_v30 = vpop.permute.xlu0 %1123  ;;  %1571 = vmatmul.mubr.msk.f32.vlgmr.msra.gmra.mrb[2].mxu1 %vm1191_vm13, %v2363_v27 }
 0x56e   :  { %1629 = vmatpush1.bf16.msra.mxu0 %v1628_v34  ;;  %v1129_v20 = vsel %vm143_vm3, %v1124_v30, %v1126_v28  ;;  %1401 = vmatprep.mubr.f32.mxu1 %v1776_v10 }
 0x56f   :  { %1282 = vmatprep.subr.mxu0 %v1129_v20 }
 0x571   :  { %v1020_v31 = vpop.permute.xlu1 %1019  ;;  %v1018_v36 = vpop.permute.xlu0 %1017  ;;  %v1187_v37 = vld [vmem:[#allocation3 + $0x190] sm:$0xff] }
 0x572   :  { %v1021_v26 = vsel %vm803_vm11, %v1016_v61, %v1018_v36  ;;  %v1022_v39 = vsel %vm803_vm11, %v1018_v36, %v1020_v31  ;;  %1283 = vmatpush1.msra.mxu0 %v1187_v37 }
 0x573   :  { %1572 = vmatmul.mubr.msk.f32.vlgmr.msra.gmra.mrb[4].mxu0 %vm1191_vm13, %v2363_v27 }
 0x575   :  { %v1035_v40 = vpop.permute.xlu1 %1034  ;;  %v1033_v41 = vpop.permute.xlu0 %1032 }
 0x576   :  { %v1036_v42 = vsel %vm823_vm12, %v2327_v60, %v1033_v41  ;;  %v1037_v43 = vsel %vm823_vm12, %v1033_v41, %v1035_v40 }
 0x577   :  { %v1630_v10 = vpack.c.bf16 %v1037_v43, %v1022_v39  ;;  %v1632_v45 = vpack.c.bf16 %v1036_v42, %v1021_v26 }
 0x579   :  { %v1050_v29 = vpop.permute.xlu1 %1049  ;;  %v1048_v46 = vpop.permute.xlu0 %1047  ;;  %1631 = vmatprep.subr.bf16.mxu1 %v1630_v10 }
 0x57a   :  { %v1051_v47 = vsel %vm840_vm15, %v2334_v63, %v1048_v46  ;;  %v1052_v48 = vsel %vm840_vm15, %v1048_v46, %v1050_v29  ;;  %1633 = vmatpush1.bf16.msra.mxu1 %v1632_v45  ;;  %v47_v29 = vld [vmem:[%s2444_s5] sm:$0xff] }
 0x57d   :  { %v1065_v49 = vpop.permute.xlu1 %1064  ;;  %v1063_v55 = vpop.permute.xlu0 %1062 }
 0x57e   :  { %v1066_v33 = vsel %vm857_vm10, %v2332_v62, %v1063_v55  ;;  %v1067_v50 = vsel %vm857_vm10, %v1063_v55, %v1065_v49 }
 0x57f   :  { %v1634_v51 = vpack.c.bf16 %v1067_v50, %v1052_v48  ;;  %v1636_v54 = vpack.c.bf16 %v1066_v33, %v1051_v47 }
 0x581   :  { %v1098_v32 = vpop.permute.xlu1 %1097  ;;  %v1083_v56 = vpop.permute.xlu0 %1082  ;;  %1635 = vmatprep.subr.bf16.mxu1 %v1634_v51 }
 0x582   :  { %v1100_v57 = vsel %vm901_vm7, %v2347_v6, %v1098_v32  ;;  %1106 = vst.msk [vmem:[#allocation3 + $0x148] sm:$0xff] %vm901_vm7, %v1098_v32  ;;  %v1085_v58 = vsel %vm71_vm2, %v2340_v1, %v1083_v56  ;;  %1637 = vmatpush1.bf16.msra.mxu1 %v1636_v54 }
 0x583   :  { %1091 = vst.msk [vmem:[#allocation3 + $0x118] sm:$0xff] %vm71_vm2, %v1083_v56  ;;  %v1640_v3 = vpack.c.bf16 %v1085_v58, %v2237_v9 }
 0x585   :  { %v1128_v60 = vpop.permute.xlu1 %1127  ;;  %v1113_v61 = vpop.permute.xlu0 %1112 }
 0x586   :  { %v1130_v62 = vsel %vm143_vm3, %v1126_v28, %v1128_v60  ;;  %1136 = vst.msk [vmem:[#allocation3 + $0x1a8] sm:$0xff] %vm143_vm3, %v1128_v60  ;;  %v1115_v63 = vsel %vm119_vm1, %v2352_v18, %v1113_v61 }
 0x587   :  { %1121 = vst.msk [vmem:[#allocation3 + $0x178] sm:$0xff] %vm119_vm1, %v1113_v61  ;;  %v1644_v35 = vpack.c.bf16 %v1115_v63, %v1100_v57 }
 0x589   :  { %v1178_v1 = vld [vmem:[#allocation3 + $0x148] sm:$0xff] }
 0x58a   :  { %v1172_v0 = vld [vmem:[#allocation3 + $0x118] sm:$0xff] }
 0x58b   :  { %v1638_v2 = vpack.c.bf16 %v1172_v0, %v2240_v38 }
 0x58d   :  { %1639 = vmatprep.subr.bf16.mxu1 %v1638_v2  ;;  %v1190_v6 = vld [vmem:[#allocation3 + $0x1a8] sm:$0xff] }
 0x58e   :  { %1641 = vmatpush1.bf16.msra.mxu1 %v1640_v3  ;;  %v1184_v4 = vld [vmem:[#allocation3 + $0x178] sm:$0xff] }
 0x58f   :  { %v1642_v5 = vpack.c.bf16 %v1184_v4, %v1178_v1 }
 0x591   :  { %1643 = vmatprep.subr.bf16.mxu1 %v1642_v5 }
 0x592   :  { %1645 = vmatpush1.bf16.msra.mxu1 %v1644_v35 }
 0x593   :  { %1353 = vmatprep.subr.mxu1 %v1190_v6 }
 0x596   :  { %1354 = vmatpush1.msra.mxu1 %v1130_v62 }
 0x597   :  { %1573 = vmatmul.mubr.msk.f32.vlgmr.msra.gmra.mrb[4].mxu1 %vm1191_vm13, %v2363_v27 }
 0x640   :  { %v1261_v7 = vpop.f32.mrb[2].mxu1 }
 0x641   :  { %v1408_v11 = vmul.f32 %v1261_v7, %v2082_v52  ;;  %v1263_v38 = vpop.f32.mrb[3].mxu1 }
 0x642   :  { %v1409_v9 = vmul.f32 %v1263_v38, %v2084_v53 }
 0x644   :  { %v1411_v12 = vadd.f32 %v1409_v9, %v1408_v11  ;;  %v48_v9 = vld [vmem:[%s2445_s6] sm:$0xff] }
 0x646   :  { %v1332_v13 = vpop.f32.mrb[4].mxu0 }
 0x647   :  { %v1410_v14 = vmul.f32 %v1332_v13, %v2088_v59  ;;  %v2400_v15 = vpop.f32.mrb[5].mxu0 }
 0x648   :  { %v1472_v44 = vmul.f32 %v2400_v15, %v2082_v52 }
 0x649   :  { %v1412_v16 = vadd.f32 %v1411_v12, %v1410_v14 }
 0x64b   :  { %1413 = vadd.xlane.f32.xlu0 %v1412_v16 }
 0x66a   :  { %v2402_v18 = vpop.f32.mrb[4].mxu1 }
 0x66b   :  { %v1473_v19 = vmul.f32 %v2402_v18, %v2084_v53  ;;  %v2408_v21 = vpop.f32.mrb[5].mxu1 }
 0x66c   :  { %v1474_v22 = vmul.f32 %v2408_v21, %v2088_v59 }
 0x66d   :  { %v1475_v23 = vadd.f32 %v1473_v19, %v1472_v44 }
 0x66f   :  { %v1476_v24 = vadd.f32 %v1475_v23, %v1474_v22 }
 0x671   :  { %1477 = vadd.xlane.f32.xlu0 %v1476_v24 }
 0x6d8   :  { %v1414_v25 = vpop.xlane.xlu0 %1413 }
 0x6d9   :  { %v1415_v8 = vrot.slane %v1414_v25, 4 }
 0x6db   :  { %v1416_v17 = vadd.f32 %v1415_v8, %v1414_v25 }
 0x6dd   :  { %v1417_v27 = vrot.slane %v1416_v17, 2 }
 0x6df   :  { %v1418_v34 = vadd.f32 %v1417_v27, %v1416_v17 }
 0x6e1   :  { %v1419_v28 = vrot.slane %v1418_v34, 1 }
 0x6e3   :  { %v1420_v30 = vadd.f32 %v1419_v28, %v1418_v34 }
 0x6e5   :  { %1658 = vpush %v1420_v30 }
 0x6fe   :  { %v1478_v51 = vpop.xlane.xlu0 %1477 }
 0x6ff   :  { %v1479_v54 = vrot.slane %v1478_v51, 4 }
 0x701   :  { %v1480_v32 = vadd.f32 %v1479_v54, %v1478_v51 }
 0x703   :  { %v1481_v56 = vrot.slane %v1480_v32, 2 }
 0x705   :  { %v1482_v58 = vadd.f32 %v1481_v56, %v1480_v32 }
 0x707   :  { %v1483_v60 = vrot.slane %v1482_v58, 1 }
 0x709   :  { %v1484_v62 = vadd.f32 %v1483_v60, %v1482_v58 }
 0x716   :  { %s1659_s4 = spop %1658 }
 0x717   :  { %s1422_s27 = smul.f32 0.00048828125, %s1659_s4 }
 0x719   :  { %v1423_v20 = vstv %s1422_s27 }
 0x71a   :  { %v1424_v31 = vsub.f32 %v1261_v7, %v1423_v20  ;;  %v1425_v36 = vsub.f32 %v1263_v38, %v1423_v20  ;;  %v1426_v37 = vsub.f32 %v1332_v13, %v1423_v20 }
 0x71c   :  { %v1427_v26 = vmul.f32 %v1424_v31, %v2082_v52  ;;  %v1428_v39 = vmul.f32 %v1425_v36, %v2084_v53  ;;  %v1429_v40 = vmul.f32 %v1426_v37, %v2088_v59 }
 0x71e   :  { %v1430_v41 = vmul.f32 %v1427_v26, %v1427_v26  ;;  %v1431_v42 = vmul.f32 %v1428_v39, %v1428_v39  ;;  %v1432_v43 = vmul.f32 %v1429_v40, %v1429_v40 }
 0x720   :  { %v1433_v10 = vadd.f32 %v1431_v42, %v1430_v41 }
 0x722   :  { %v1434_v45 = vadd.f32 %v1433_v10, %v1432_v43 }
 0x724   :  { %1435 = vadd.xlane.f32.xlu1 %v1434_v45 }
 0x735   :  { %1455 = vperm.xlu1 %1689, %v47_v29  }
 0x7b1   :  { %v1436_v46 = vpop.xlane.xlu1 %1435 }
 0x7b2   :  { %v1437_v47 = vrot.slane %v1436_v46, 4 }
 0x7b4   :  { %v1438_v48 = vadd.f32 %v1437_v47, %v1436_v46 }
 0x7b6   :  { %v1439_v49 = vrot.slane %v1438_v48, 2 }
 0x7b8   :  { %v1440_v55 = vadd.f32 %v1439_v49, %v1438_v48 }
 0x7ba   :  { %v1441_v33 = vrot.slane %v1440_v55, 1 }
 0x7bc   :  { %v1442_v50 = vadd.f32 %v1441_v33, %v1440_v55 }
 0x7be   :  { %1660 = vpush %v1442_v50 }
 0x7ef   :  { %s1661_s14 = spop %1660 }
 0x7f0   :  { %s1444_s7 = smul.f32 0.00048828125, %s1661_s14 }
 0x7f2   :  { %s1445_s15 = sadd.f32 1e-05, %s1444_s7 }
 0x7f4   :  { %v1446_v57 = vstv %s1445_s15 }
 0x7f5   :  { %1715 = vrsqrt.f32 %v1446_v57 }
 0x7ff   :  { %v1716_v61 = vpop.eup %1715 }
 0x800   :  { %1662 = vpush %v1716_v61 }
 0x801   :  { %1664 = vpush %v1484_v62 }
 0x831   :  { %s1663_s5 = spop %1662 }
 0x832   :  { %s1665_s16 = spop %1664  ;;  %v1449_v12 = vstv %s1663_s5 }
 0x833   :  { %s1486_s17 = smul.f32 0.00048828125, %s1665_s16  ;;  %v1452_v16 = vmul.f32 %v1449_v12, %v1429_v40 }
 0x835   :  { %v1487_v63 = vstv %s1486_s17 }
 0x836   :  { %v1488_v0 = vsub.f32 %v2400_v15, %v1487_v63  ;;  %v1489_v2 = vsub.f32 %v2402_v18, %v1487_v63  ;;  %v1490_v3 = vsub.f32 %v2408_v21, %v1487_v63  ;;  %v1450_v15 = vmul.f32 %v1449_v12, %v1427_v26 }
 0x838   :  { %v1491_v1 = vmul.f32 %v1488_v0, %v2082_v52  ;;  %v1492_v4 = vmul.f32 %v1489_v2, %v2084_v53  ;;  %v1493_v5 = vmul.f32 %v1490_v3, %v2088_v59  ;;  %v1451_v52 = vmul.f32 %v1449_v12, %v1428_v39  ;;  %v1456_v59 = vpop.permute.xlu1 %1455 }
 0x839   :  { %v1458_v44 = vmul.f32 %v1456_v59, %v1450_v15  ;;  %v1460_v21 = vmul.f32 %v1456_v59, %v1452_v16 }
 0x83a   :  { %v1494_v35 = vmul.f32 %v1491_v1, %v1491_v1  ;;  %v1495_v6 = vmul.f32 %v1492_v4, %v1492_v4  ;;  %v1496_v7 = vmul.f32 %v1493_v5, %v1493_v5  ;;  %v1459_v19 = vmul.f32 %v1456_v59, %v1451_v52 }
 0x83c   :  { %v1497_v11 = vadd.f32 %v1495_v6, %v1494_v35 }
 0x83e   :  { %v1498_v38 = vadd.f32 %v1497_v11, %v1496_v7 }
 0x840   :  { %1499 = vadd.xlane.f32.xlu0 %v1498_v38 }
 0x856   :  { %1463 = vperm.xlu0 %1690, %v48_v9  }
 0x8cd   :  { %v1500_v13 = vpop.xlane.xlu0 %1499 }
 0x8ce   :  { %v1501_v14 = vrot.slane %v1500_v13, 4 }
 0x8d0   :  { %v1502_v53 = vadd.f32 %v1501_v14, %v1500_v13 }
 0x8d2   :  { %v1503_v18 = vrot.slane %v1502_v53, 2 }
 0x8d4   :  { %v1504_v22 = vadd.f32 %v1503_v18, %v1502_v53 }
 0x8d5   :  { %v1464_v23 = vpop.permute.xlu0 %1463 }
 0x8d6   :  { %v1466_v24 = vadd.f32 %v1464_v23, %v1458_v44  ;;  %v1467_v25 = vadd.f32 %v1464_v23, %v1459_v19  ;;  %v1468_v8 = vadd.f32 %v1464_v23, %v1460_v21  ;;  %v1505_v17 = vrot.slane %v1504_v22, 1 }
 0x8d8   :  { %1469 = vst [vmem:[#allocation7] sm:$0xff] %v1466_v24  ;;  %1470 = vst [vmem:[#allocation7 + $0x8] sm:$0xff] %v1467_v25  ;;  %v1506_v27 = vadd.f32 %v1505_v17, %v1504_v22 }
 0x8d9   :  { %1471 = vst [vmem:[#allocation7 + $0x10] sm:$0xff] %v1468_v8 }
 0x8da   :  { %1666 = vpush %v1506_v27 }
 0x90b   :  { %s1667_s6 = spop %1666 }
 0x90c   :  { %s1508_s20 = smul.f32 0.00048828125, %s1667_s6 }
 0x90e   :  { %s1509_s2 = sadd.f32 1e-05, %s1508_s20 }
 0x910   :  { %v1510_v34 = vstv %s1509_s2 }
 0x911   :  { %1717 = vrsqrt.f32 %v1510_v34 }
 0x91b   :  { %v1718_v28 = vpop.eup %1717 }
 0x91c   :  { %1668 = vpush %v1718_v28 }
 0x94d   :  { %s1669_s21 = spop %1668 }
 0x94e   :  { %v1513_v30 = vstv %s1669_s21 }
 0x94f   :  { %v1514_v20 = vmul.f32 %v1513_v30, %v1491_v1  ;;  %v1515_v31 = vmul.f32 %v1513_v30, %v1492_v4  ;;  %v1516_v36 = vmul.f32 %v1513_v30, %v1493_v5 }
 0x951   :  { %v1517_v37 = vmul.f32 %v1514_v20, %v1456_v59  ;;  %v1518_v26 = vmul.f32 %v1515_v31, %v1456_v59  ;;  %v1519_v39 = vmul.f32 %v1516_v36, %v1456_v59 }
 0x953   :  { %v1520_v40 = vadd.f32 %v1517_v37, %v1464_v23  ;;  %v1521_v41 = vadd.f32 %v1518_v26, %v1464_v23  ;;  %v1522_v42 = vadd.f32 %v1519_v39, %v1464_v23 }
 0x955   :  { %1524 = vst [vmem:[#allocation7 + $0x18] sm:$0xff] %v1520_v40  ;;  %1525 = vst [vmem:[#allocation7 + $0x20] sm:$0xff] %v1521_v41 }
 0x956   :  { %1526 = vst [vmem:[#allocation7 + $0x28] sm:$0xff] %v1522_v42 }
 0x957   :  { %1752 = shalt.err (!%p1749_p12)
}
 0x958   :  { %s1753_s28 = scalar_lea.hbm %s2447_s8, 768 }
 0x959   :  { %p1754_p13 = scmp.ne.s32.totalorder %s2447_s8, %s1753_s28  ;;  %p1757_p0 = scmp.lt.u32.totalorder %s1753_s28, %s2447_s8 }
 0x95b   :  { %p1759_p1 = pnand %p1757_p0, %p1754_p13 }
 0x95d   :  { %1762 = shalt.err (!%p1759_p1)
}
 0x95e   :  { %s1784_s11 = smov 384   ;;  %s1785_s12 = smov 24  }
 0x95f   :  { %1538 = dma.vmem_to_hbm [thread:$0]  %s1533_s23, 768, %s2447_s8, [#allocation6], %s1784_s11, %s1784_s11, %s1785_s12  }
 0x960   :  { %1765 = dma.done.wait [#allocation6], 768  }
 0x961   :  { %1766 = vsyncadd [#allocation6], 4294966528 }
 0x962   :  { %1542 = vsyncpa [#allocation5], 1 }
 0x963   :  { %1543 = vsyncpa [#allocation6], 1 }

</bundles_post_ra>
